<compile_context>
chip_gen: v5e
topology: v5e:2x2
jax: 0.10.0
libtpu: 0.0.40
codegen_flags: <defaults>
</compile_context>

<pallas_src>
import functools

import jax
import jax.numpy as jnp
from jax.experimental import pallas as pl
from jax.experimental.pallas import tpu as pltpu

HIDDEN_SIZE = 10
INPUT_SIZE = 3
GATES = 4 * HIDDEN_SIZE
BP = 8  # batch padded to one sublane

# Sublane-aligned row offsets inside the packed weight buffer (last dim = 4H).
R_WIH0 = 0    # (I, 4H)
R_B0 = 8      # (1, 4H)   b_ih0 + b_hh0
R_WHH0 = 16   # (H, 4H)
R_WIH1 = 32   # (H, 4H)
R_WHH1 = 48   # (H, 4H)
R_B1 = 64     # (1, 4H)   b_ih1 + b_hh1
R_WLIN = 72   # (1, 4H)   only first H lanes used
R_BLIN = 80   # (1, 4H)   only lane 0 used
R_TOTAL = 88


def _lstm_linear_kernel(x_ref, w_ref, out_ref, *, T):
    H = HIDDEN_SIZE
    G = GATES

    # Static, sublane-aligned slices of the single packed weight buffer
    # (all loop-invariant; loaded once before the recurrence).
    wih0 = w_ref[R_WIH0:R_WIH0 + INPUT_SIZE, :]          # (I, 4H)
    b0 = w_ref[R_B0:R_B0 + 1, :]                         # (1, 4H)
    whh0 = w_ref[R_WHH0:R_WHH0 + H, :]                   # (H, 4H)
    wih1 = w_ref[R_WIH1:R_WIH1 + H, :]                   # (H, 4H)
    whh1 = w_ref[R_WHH1:R_WHH1 + H, :]                   # (H, 4H)
    b1 = jnp.broadcast_to(w_ref[R_B1:R_B1 + 1, :], (BP, G))
    wlin = w_ref[R_WLIN:R_WLIN + 1, :H]                  # (1, H)
    blin = w_ref[R_BLIN:R_BLIN + 1, 0:1]                 # (1, 1)

    # Hoisted layer-0 input projection: a single (T*BP, I) @ (I, 4H) matmul,
    # layer-0 fused bias folded in.  Per-step slices below start at multiples
    # of 8 rows (whole-sublane selects).
    gx = (jnp.dot(x_ref[...], wih0, preferred_element_type=jnp.float32)
          + b0)                                          # (T*BP, 4H)

    def gates_to_hc(gates, c_prev):
        # PyTorch gate order: i, f, g, o.  One sigmoid over the whole 4H-lane
        # vreg, one tanh for the g slice (2 EUP launches per cell).
        sig = jax.nn.sigmoid(gates)
        i = sig[:, 0 * H:1 * H]
        f = sig[:, 1 * H:2 * H]
        o = sig[:, 3 * H:4 * H]
        g = jnp.tanh(gates[:, 2 * H:3 * H])
        c_new = f * c_prev + i * g
        h_new = o * jnp.tanh(c_new)
        return h_new, c_new

    zeros = jnp.zeros((BP, H), jnp.float32)  # PyTorch default zero init state
    h0, c0, h1, c1 = zeros, zeros, zeros, zeros

    # T is small & static: fully unroll; states stay in vregs as carries.
    # Data deps form a wavefront: h0_{t+1} depends only on h0_t, so the
    # layer-1 cell for step t overlaps layer-0's step t+1.
    for t in range(T):
        # ---- layer 0: the only true serial chain
        rec0 = jnp.dot(h0, whh0, preferred_element_type=jnp.float32)
        h0, c0 = gates_to_hc(gx[t * BP:(t + 1) * BP, :] + rec0, c0)

        # ---- layer 1: off the layer-0 critical path
        rec1 = jnp.dot(h1, whh1, preferred_element_type=jnp.float32)
        gin1 = jnp.dot(h0, wih1, preferred_element_type=jnp.float32)
        h1, c1 = gates_to_hc(gin1 + rec1 + b1, c1)

    # Linear(hidden_size, 1) on the last top-layer hidden state:
    # VPU multiply + lane reduce (cheaper than an N=1 MXU push/pop).
    out_ref[...] = (jnp.sum(h1 * wlin, axis=-1, keepdims=True) + blin)


def model_forward(x, wbuf):
    """x: (seq_len, batch, input_size); wbuf: packed (R_TOTAL, 4H) weights."""
    T, B, I = x.shape
    assert I == INPUT_SIZE and B <= BP

    # Pad batch to one sublane (8): per-step slices and stores stay aligned;
    # padded rows never interact with real rows (batch dim is independent).
    x_pad = jnp.zeros((T, BP, INPUT_SIZE), jnp.float32).at[:, :B, :].set(x)
    x_flat = x_pad.reshape(T * BP, INPUT_SIZE)

    vmem = pl.BlockSpec(memory_space=pltpu.MemorySpace.VMEM)
    kernel = functools.partial(_lstm_linear_kernel, T=T)

    # Total footprint is a few KiB: everything lives in VMEM, no grid /
    # tiling / pipelining needed on any TPU generation.
    out = pl.pallas_call(
        kernel,
        out_shape=jax.ShapeDtypeStruct((BP, 1), jnp.float32),
        in_specs=[vmem, vmem],
        out_specs=vmem,
    )(x_flat, wbuf)
    return out[:B]


def init_params(key):
    """Deterministic params; shapes match nn.LSTM(3, 10, 2) + nn.Linear(10, 1).

    Returns ONE packed (R_TOTAL, 4H) f32 buffer: weights transposed for
    x @ W, ih/hh bias pairs fused, rows placed at sublane-aligned offsets.
    """
    H, I = HIDDEN_SIZE, INPUT_SIZE
    k = 1.0 / jnp.sqrt(H)
    keys = jax.random.split(key, 10)

    def u(kk, shape):
        return jax.random.uniform(kk, shape, jnp.float32, -k, k)

    # PyTorch layout: weight_ih_l0 (4H, I), weight_hh_l0 (4H, H), biases (4H,)
    w_ih0 = u(keys[0], (4 * H, I))
    w_hh0 = u(keys[1], (4 * H, H))
    b_ih0 = u(keys[2], (4 * H,))
    b_hh0 = u(keys[3], (4 * H,))
    w_ih1 = u(keys[4], (4 * H, H))
    w_hh1 = u(keys[5], (4 * H, H))
    b_ih1 = u(keys[6], (4 * H,))
    b_hh1 = u(keys[7], (4 * H,))
    w_lin = u(keys[8], (1, H))
    b_lin = u(keys[9], (1,))

    wbuf = jnp.zeros((R_TOTAL, GATES), jnp.float32)
    wbuf = wbuf.at[R_WIH0:R_WIH0 + I, :].set(w_ih0.T)
    wbuf = wbuf.at[R_B0, :].set(b_ih0 + b_hh0)
    wbuf = wbuf.at[R_WHH0:R_WHH0 + H, :].set(w_hh0.T)
    wbuf = wbuf.at[R_WIH1:R_WIH1 + H, :].set(w_ih1.T)
    wbuf = wbuf.at[R_WHH1:R_WHH1 + H, :].set(w_hh1.T)
    wbuf = wbuf.at[R_B1, :].set(b_ih1 + b_hh1)
    wbuf = wbuf.at[R_WLIN, :H].set(w_lin[0])
    wbuf = wbuf.at[R_BLIN, 0].set(b_lin[0])
    return wbuf


def reference_forward(x, wbuf):
    """Pure-JAX reference implementing the same PyTorch semantics."""
    H = HIDDEN_SIZE
    T, B, _ = x.shape

    wih0 = wbuf[R_WIH0:R_WIH0 + INPUT_SIZE]
    b0 = wbuf[R_B0]
    whh0 = wbuf[R_WHH0:R_WHH0 + H]
    wih1 = wbuf[R_WIH1:R_WIH1 + H]
    whh1 = wbuf[R_WHH1:R_WHH1 + H]
    b1 = wbuf[R_B1]
    wlin = wbuf[R_WLIN, :H].reshape(H, 1)
    blin = wbuf[R_BLIN, 0]

    def cell(x_t, h, c, wih, whh, b):
        gates = x_t @ wih + h @ whh + b
        i = jax.nn.sigmoid(gates[:, 0 * H:1 * H])
        f = jax.nn.sigmoid(gates[:, 1 * H:2 * H])
        g = jnp.tanh(gates[:, 2 * H:3 * H])
        o = jax.nn.sigmoid(gates[:, 3 * H:4 * H])
        c_new = f * c + i * g
        return o * jnp.tanh(c_new), c_new

    h0 = c0 = h1 = c1 = jnp.zeros((B, H), jnp.float32)
    for t in range(T):
        h0, c0 = cell(x[t], h0, c0, wih0, whh0, b0)
        h1, c1 = cell(h0, h1, c1, wih1, whh1, b1)
    return h1 @ wlin + blin


if __name__ == "__main__":
    key = jax.random.PRNGKey(0)
    k_param, k_x = jax.random.split(key)

    seq_len, batch = 8, 2
    x = jax.random.normal(k_x, (seq_len, batch, INPUT_SIZE), jnp.float32)
    wbuf = init_params(k_param)

    out = model_forward(x, wbuf)
    out = jax.block_until_ready(out)

    ref = reference_forward(x, wbuf)
    assert out.shape == (batch, 1)
    assert jnp.allclose(out, ref, atol=1e-4, rtol=1e-4), (out, ref)

    print("KERNEL_OK")
</pallas_src>

<mosaic_0001>
module attributes {stable_mosaic.version = 11 : i64} {
  func.func @_lstm_linear_kernel(%arg0: memref<64x3xf32, #tpu.memory_space<vmem>>, %arg1: memref<88x40xf32, #tpu.memory_space<vmem>>, %arg2: memref<8x1xf32, #tpu.memory_space<vmem>>) attributes {dimension_semantics = [], scalar_prefetch = 0 : i64, scratch_operands = 0 : i64, tpu.core_type = #tpu.core_type<tc>} {
    %c0 = arith.constant 0 : index
    %c0_0 = arith.constant 0 : index
    %0 = vector.load %arg1[%c0, %c0_0] : memref<88x40xf32, #tpu.memory_space<vmem>>, vector<3x40xf32>
    %c8 = arith.constant 8 : index
    %c0_1 = arith.constant 0 : index
    %1 = vector.load %arg1[%c8, %c0_1] : memref<88x40xf32, #tpu.memory_space<vmem>>, vector<1x40xf32>
    %c16 = arith.constant 16 : index
    %c0_2 = arith.constant 0 : index
    %2 = vector.load %arg1[%c16, %c0_2] : memref<88x40xf32, #tpu.memory_space<vmem>>, vector<10x40xf32>
    %c32 = arith.constant 32 : index
    %c0_3 = arith.constant 0 : index
    %3 = vector.load %arg1[%c32, %c0_3] : memref<88x40xf32, #tpu.memory_space<vmem>>, vector<10x40xf32>
    %c48 = arith.constant 48 : index
    %c0_4 = arith.constant 0 : index
    %4 = vector.load %arg1[%c48, %c0_4] : memref<88x40xf32, #tpu.memory_space<vmem>>, vector<10x40xf32>
    %c64 = arith.constant 64 : index
    %c0_5 = arith.constant 0 : index
    %5 = vector.load %arg1[%c64, %c0_5] : memref<88x40xf32, #tpu.memory_space<vmem>>, vector<1x40xf32>
    %6 = vector.shape_cast %5 : vector<1x40xf32> to vector<1x40xf32>
    %7 = vector.broadcast %6 : vector<1x40xf32> to vector<8x40xf32>
    %c72 = arith.constant 72 : index
    %c0_6 = arith.constant 0 : index
    %8 = vector.load %arg1[%c72, %c0_6] : memref<88x40xf32, #tpu.memory_space<vmem>>, vector<1x10xf32>
    %c80 = arith.constant 80 : index
    %c0_7 = arith.constant 0 : index
    %9 = vector.load %arg1[%c80, %c0_7] : memref<88x40xf32, #tpu.memory_space<vmem>>, vector<1x1xf32>
    %c0_8 = arith.constant 0 : index
    %c0_9 = arith.constant 0 : index
    %10 = vector.load %arg0[%c0_8, %c0_9] : memref<64x3xf32, #tpu.memory_space<vmem>>, vector<64x3xf32>
    %cst = arith.constant dense<0.000000e+00> : vector<64x40xf32>
    %11 = tpu.matmul %10, %0, %cst {dimension_numbers = #tpu.dot_dimension_numbers<[1], [0], [0], [1], [0, 0, 1, 1], [], []>} : vector<64x3xf32>, vector<3x40xf32>, vector<64x40xf32> -> vector<64x40xf32>
    %12 = vector.broadcast %1 : vector<1x40xf32> to vector<64x40xf32>
    %13 = arith.addf %11, %12 : vector<64x40xf32>
    %cst_10 = arith.constant 0.000000e+00 : f32
    %14 = vector.broadcast %cst_10 : f32 to vector<8x10xf32>
    %cst_11 = arith.constant dense<0.000000e+00> : vector<8x40xf32>
    %15 = tpu.matmul %14, %2, %cst_11 {dimension_numbers = #tpu.dot_dimension_numbers<[1], [0], [0], [1], [0, 0, 1, 1], [], []>} : vector<8x10xf32>, vector<10x40xf32>, vector<8x40xf32> -> vector<8x40xf32>
    %16 = vector.extract_strided_slice %13 {offsets = [0, 0], sizes = [8, 40], strides = [1, 1]} : vector<64x40xf32> to vector<8x40xf32>
    %17 = arith.addf %16, %15 : vector<8x40xf32>
    %18 = arith.negf %17 : vector<8x40xf32>
    %19 = math.exp %18 : vector<8x40xf32>
    %cst_12 = arith.constant 1.000000e+00 : f32
    %20 = vector.broadcast %cst_12 : f32 to vector<8x40xf32>
    %21 = arith.addf %20, %19 : vector<8x40xf32>
    %22 = arith.divf %20, %21 : vector<8x40xf32>
    %23 = vector.extract_strided_slice %22 {offsets = [0, 0], sizes = [8, 10], strides = [1, 1]} : vector<8x40xf32> to vector<8x10xf32>
    %24 = vector.extract_strided_slice %22 {offsets = [0, 10], sizes = [8, 10], strides = [1, 1]} : vector<8x40xf32> to vector<8x10xf32>
    %25 = vector.extract_strided_slice %22 {offsets = [0, 30], sizes = [8, 10], strides = [1, 1]} : vector<8x40xf32> to vector<8x10xf32>
    %26 = vector.extract_strided_slice %17 {offsets = [0, 20], sizes = [8, 10], strides = [1, 1]} : vector<8x40xf32> to vector<8x10xf32>
    %27 = math.tanh %26 : vector<8x10xf32>
    %28 = arith.mulf %24, %14 : vector<8x10xf32>
    %29 = arith.mulf %23, %27 : vector<8x10xf32>
    %30 = arith.addf %28, %29 : vector<8x10xf32>
    %31 = math.tanh %30 : vector<8x10xf32>
    %32 = arith.mulf %25, %31 : vector<8x10xf32>
    %cst_13 = arith.constant dense<0.000000e+00> : vector<8x40xf32>
    %33 = tpu.matmul %14, %4, %cst_13 {dimension_numbers = #tpu.dot_dimension_numbers<[1], [0], [0], [1], [0, 0, 1, 1], [], []>} : vector<8x10xf32>, vector<10x40xf32>, vector<8x40xf32> -> vector<8x40xf32>
    %cst_14 = arith.constant dense<0.000000e+00> : vector<8x40xf32>
    %34 = tpu.matmul %32, %3, %cst_14 {dimension_numbers = #tpu.dot_dimension_numbers<[1], [0], [0], [1], [0, 0, 1, 1], [], []>} : vector<8x10xf32>, vector<10x40xf32>, vector<8x40xf32> -> vector<8x40xf32>
    %35 = arith.addf %34, %33 : vector<8x40xf32>
    %36 = arith.addf %35, %7 : vector<8x40xf32>
    %37 = arith.negf %36 : vector<8x40xf32>
    %38 = math.exp %37 : vector<8x40xf32>
    %cst_15 = arith.constant 1.000000e+00 : f32
    %39 = vector.broadcast %cst_15 : f32 to vector<8x40xf32>
    %40 = arith.addf %39, %38 : vector<8x40xf32>
    %41 = arith.divf %39, %40 : vector<8x40xf32>
    %42 = vector.extract_strided_slice %41 {offsets = [0, 0], sizes = [8, 10], strides = [1, 1]} : vector<8x40xf32> to vector<8x10xf32>
    %43 = vector.extract_strided_slice %41 {offsets = [0, 10], sizes = [8, 10], strides = [1, 1]} : vector<8x40xf32> to vector<8x10xf32>
    %44 = vector.extract_strided_slice %41 {offsets = [0, 30], sizes = [8, 10], strides = [1, 1]} : vector<8x40xf32> to vector<8x10xf32>
    %45 = vector.extract_strided_slice %36 {offsets = [0, 20], sizes = [8, 10], strides = [1, 1]} : vector<8x40xf32> to vector<8x10xf32>
    %46 = math.tanh %45 : vector<8x10xf32>
    %47 = arith.mulf %43, %14 : vector<8x10xf32>
    %48 = arith.mulf %42, %46 : vector<8x10xf32>
    %49 = arith.addf %47, %48 : vector<8x10xf32>
    %50 = math.tanh %49 : vector<8x10xf32>
    %51 = arith.mulf %44, %50 : vector<8x10xf32>
    %cst_16 = arith.constant dense<0.000000e+00> : vector<8x40xf32>
    %52 = tpu.matmul %32, %2, %cst_16 {dimension_numbers = #tpu.dot_dimension_numbers<[1], [0], [0], [1], [0, 0, 1, 1], [], []>} : vector<8x10xf32>, vector<10x40xf32>, vector<8x40xf32> -> vector<8x40xf32>
    %53 = vector.extract_strided_slice %13 {offsets = [8, 0], sizes = [8, 40], strides = [1, 1]} : vector<64x40xf32> to vector<8x40xf32>
    %54 = arith.addf %53, %52 : vector<8x40xf32>
    %55 = arith.negf %54 : vector<8x40xf32>
    %56 = math.exp %55 : vector<8x40xf32>
    %cst_17 = arith.constant 1.000000e+00 : f32
    %57 = vector.broadcast %cst_17 : f32 to vector<8x40xf32>
    %58 = arith.addf %57, %56 : vector<8x40xf32>
    %59 = arith.divf %57, %58 : vector<8x40xf32>
    %60 = vector.extract_strided_slice %59 {offsets = [0, 0], sizes = [8, 10], strides = [1, 1]} : vector<8x40xf32> to vector<8x10xf32>
    %61 = vector.extract_strided_slice %59 {offsets = [0, 10], sizes = [8, 10], strides = [1, 1]} : vector<8x40xf32> to vector<8x10xf32>
    %62 = vector.extract_strided_slice %59 {offsets = [0, 30], sizes = [8, 10], strides = [1, 1]} : vector<8x40xf32> to vector<8x10xf32>
    %63 = vector.extract_strided_slice %54 {offsets = [0, 20], sizes = [8, 10], strides = [1, 1]} : vector<8x40xf32> to vector<8x10xf32>
    %64 = math.tanh %63 : vector<8x10xf32>
    %65 = arith.mulf %61, %30 : vector<8x10xf32>
    %66 = arith.mulf %60, %64 : vector<8x10xf32>
    %67 = arith.addf %65, %66 : vector<8x10xf32>
    %68 = math.tanh %67 : vector<8x10xf32>
    %69 = arith.mulf %62, %68 : vector<8x10xf32>
    %cst_18 = arith.constant dense<0.000000e+00> : vector<8x40xf32>
    %70 = tpu.matmul %51, %4, %cst_18 {dimension_numbers = #tpu.dot_dimension_numbers<[1], [0], [0], [1], [0, 0, 1, 1], [], []>} : vector<8x10xf32>, vector<10x40xf32>, vector<8x40xf32> -> vector<8x40xf32>
    %cst_19 = arith.constant dense<0.000000e+00> : vector<8x40xf32>
    %71 = tpu.matmul %69, %3, %cst_19 {dimension_numbers = #tpu.dot_dimension_numbers<[1], [0], [0], [1], [0, 0, 1, 1], [], []>} : vector<8x10xf32>, vector<10x40xf32>, vector<8x40xf32> -> vector<8x40xf32>
    %72 = arith.addf %71, %70 : vector<8x40xf32>
    %73 = arith.addf %72, %7 : vector<8x40xf32>
    %74 = arith.negf %73 : vector<8x40xf32>
    %75 = math.exp %74 : vector<8x40xf32>
    %cst_20 = arith.constant 1.000000e+00 : f32
    %76 = vector.broadcast %cst_20 : f32 to vector<8x40xf32>
    %77 = arith.addf %76, %75 : vector<8x40xf32>
    %78 = arith.divf %76, %77 : vector<8x40xf32>
    %79 = vector.extract_strided_slice %78 {offsets = [0, 0], sizes = [8, 10], strides = [1, 1]} : vector<8x40xf32> to vector<8x10xf32>
    %80 = vector.extract_strided_slice %78 {offsets = [0, 10], sizes = [8, 10], strides = [1, 1]} : vector<8x40xf32> to vector<8x10xf32>
    %81 = vector.extract_strided_slice %78 {offsets = [0, 30], sizes = [8, 10], strides = [1, 1]} : vector<8x40xf32> to vector<8x10xf32>
    %82 = vector.extract_strided_slice %73 {offsets = [0, 20], sizes = [8, 10], strides = [1, 1]} : vector<8x40xf32> to vector<8x10xf32>
    %83 = math.tanh %82 : vector<8x10xf32>
    %84 = arith.mulf %80, %49 : vector<8x10xf32>
    %85 = arith.mulf %79, %83 : vector<8x10xf32>
    %86 = arith.addf %84, %85 : vector<8x10xf32>
    %87 = math.tanh %86 : vector<8x10xf32>
    %88 = arith.mulf %81, %87 : vector<8x10xf32>
    %cst_21 = arith.constant dense<0.000000e+00> : vector<8x40xf32>
    %89 = tpu.matmul %69, %2, %cst_21 {dimension_numbers = #tpu.dot_dimension_numbers<[1], [0], [0], [1], [0, 0, 1, 1], [], []>} : vector<8x10xf32>, vector<10x40xf32>, vector<8x40xf32> -> vector<8x40xf32>
    %90 = vector.extract_strided_slice %13 {offsets = [16, 0], sizes = [8, 40], strides = [1, 1]} : vector<64x40xf32> to vector<8x40xf32>
    %91 = arith.addf %90, %89 : vector<8x40xf32>
    %92 = arith.negf %91 : vector<8x40xf32>
    %93 = math.exp %92 : vector<8x40xf32>
    %cst_22 = arith.constant 1.000000e+00 : f32
    %94 = vector.broadcast %cst_22 : f32 to vector<8x40xf32>
    %95 = arith.addf %94, %93 : vector<8x40xf32>
    %96 = arith.divf %94, %95 : vector<8x40xf32>
    %97 = vector.extract_strided_slice %96 {offsets = [0, 0], sizes = [8, 10], strides = [1, 1]} : vector<8x40xf32> to vector<8x10xf32>
    %98 = vector.extract_strided_slice %96 {offsets = [0, 10], sizes = [8, 10], strides = [1, 1]} : vector<8x40xf32> to vector<8x10xf32>
    %99 = vector.extract_strided_slice %96 {offsets = [0, 30], sizes = [8, 10], strides = [1, 1]} : vector<8x40xf32> to vector<8x10xf32>
    %100 = vector.extract_strided_slice %91 {offsets = [0, 20], sizes = [8, 10], strides = [1, 1]} : vector<8x40xf32> to vector<8x10xf32>
    %101 = math.tanh %100 : vector<8x10xf32>
    %102 = arith.mulf %98, %67 : vector<8x10xf32>
    %103 = arith.mulf %97, %101 : vector<8x10xf32>
    %104 = arith.addf %102, %103 : vector<8x10xf32>
    %105 = math.tanh %104 : vector<8x10xf32>
    %106 = arith.mulf %99, %105 : vector<8x10xf32>
    %cst_23 = arith.constant dense<0.000000e+00> : vector<8x40xf32>
    %107 = tpu.matmul %88, %4, %cst_23 {dimension_numbers = #tpu.dot_dimension_numbers<[1], [0], [0], [1], [0, 0, 1, 1], [], []>} : vector<8x10xf32>, vector<10x40xf32>, vector<8x40xf32> -> vector<8x40xf32>
    %cst_24 = arith.constant dense<0.000000e+00> : vector<8x40xf32>
    %108 = tpu.matmul %106, %3, %cst_24 {dimension_numbers = #tpu.dot_dimension_numbers<[1], [0], [0], [1], [0, 0, 1, 1], [], []>} : vector<8x10xf32>, vector<10x40xf32>, vector<8x40xf32> -> vector<8x40xf32>
    %109 = arith.addf %108, %107 : vector<8x40xf32>
    %110 = arith.addf %109, %7 : vector<8x40xf32>
    %111 = arith.negf %110 : vector<8x40xf32>
    %112 = math.exp %111 : vector<8x40xf32>
    %cst_25 = arith.constant 1.000000e+00 : f32
    %113 = vector.broadcast %cst_25 : f32 to vector<8x40xf32>
    %114 = arith.addf %113, %112 : vector<8x40xf32>
    %115 = arith.divf %113, %114 : vector<8x40xf32>
    %116 = vector.extract_strided_slice %115 {offsets = [0, 0], sizes = [8, 10], strides = [1, 1]} : vector<8x40xf32> to vector<8x10xf32>
    %117 = vector.extract_strided_slice %115 {offsets = [0, 10], sizes = [8, 10], strides = [1, 1]} : vector<8x40xf32> to vector<8x10xf32>
    %118 = vector.extract_strided_slice %115 {offsets = [0, 30], sizes = [8, 10], strides = [1, 1]} : vector<8x40xf32> to vector<8x10xf32>
    %119 = vector.extract_strided_slice %110 {offsets = [0, 20], sizes = [8, 10], strides = [1, 1]} : vector<8x40xf32> to vector<8x10xf32>
    %120 = math.tanh %119 : vector<8x10xf32>
    %121 = arith.mulf %117, %86 : vector<8x10xf32>
    %122 = arith.mulf %116, %120 : vector<8x10xf32>
    %123 = arith.addf %121, %122 : vector<8x10xf32>
    %124 = math.tanh %123 : vector<8x10xf32>
    %125 = arith.mulf %118, %124 : vector<8x10xf32>
    %cst_26 = arith.constant dense<0.000000e+00> : vector<8x40xf32>
    %126 = tpu.matmul %106, %2, %cst_26 {dimension_numbers = #tpu.dot_dimension_numbers<[1], [0], [0], [1], [0, 0, 1, 1], [], []>} : vector<8x10xf32>, vector<10x40xf32>, vector<8x40xf32> -> vector<8x40xf32>
    %127 = vector.extract_strided_slice %13 {offsets = [24, 0], sizes = [8, 40], strides = [1, 1]} : vector<64x40xf32> to vector<8x40xf32>
    %128 = arith.addf %127, %126 : vector<8x40xf32>
    %129 = arith.negf %128 : vector<8x40xf32>
    %130 = math.exp %129 : vector<8x40xf32>
    %cst_27 = arith.constant 1.000000e+00 : f32
    %131 = vector.broadcast %cst_27 : f32 to vector<8x40xf32>
    %132 = arith.addf %131, %130 : vector<8x40xf32>
    %133 = arith.divf %131, %132 : vector<8x40xf32>
    %134 = vector.extract_strided_slice %133 {offsets = [0, 0], sizes = [8, 10], strides = [1, 1]} : vector<8x40xf32> to vector<8x10xf32>
    %135 = vector.extract_strided_slice %133 {offsets = [0, 10], sizes = [8, 10], strides = [1, 1]} : vector<8x40xf32> to vector<8x10xf32>
    %136 = vector.extract_strided_slice %133 {offsets = [0, 30], sizes = [8, 10], strides = [1, 1]} : vector<8x40xf32> to vector<8x10xf32>
    %137 = vector.extract_strided_slice %128 {offsets = [0, 20], sizes = [8, 10], strides = [1, 1]} : vector<8x40xf32> to vector<8x10xf32>
    %138 = math.tanh %137 : vector<8x10xf32>
    %139 = arith.mulf %135, %104 : vector<8x10xf32>
    %140 = arith.mulf %134, %138 : vector<8x10xf32>
    %141 = arith.addf %139, %140 : vector<8x10xf32>
    %142 = math.tanh %141 : vector<8x10xf32>
    %143 = arith.mulf %136, %142 : vector<8x10xf32>
    %cst_28 = arith.constant dense<0.000000e+00> : vector<8x40xf32>
    %144 = tpu.matmul %125, %4, %cst_28 {dimension_numbers = #tpu.dot_dimension_numbers<[1], [0], [0], [1], [0, 0, 1, 1], [], []>} : vector<8x10xf32>, vector<10x40xf32>, vector<8x40xf32> -> vector<8x40xf32>
    %cst_29 = arith.constant dense<0.000000e+00> : vector<8x40xf32>
    %145 = tpu.matmul %143, %3, %cst_29 {dimension_numbers = #tpu.dot_dimension_numbers<[1], [0], [0], [1], [0, 0, 1, 1], [], []>} : vector<8x10xf32>, vector<10x40xf32>, vector<8x40xf32> -> vector<8x40xf32>
    %146 = arith.addf %145, %144 : vector<8x40xf32>
    %147 = arith.addf %146, %7 : vector<8x40xf32>
    %148 = arith.negf %147 : vector<8x40xf32>
    %149 = math.exp %148 : vector<8x40xf32>
    %cst_30 = arith.constant 1.000000e+00 : f32
    %150 = vector.broadcast %cst_30 : f32 to vector<8x40xf32>
    %151 = arith.addf %150, %149 : vector<8x40xf32>
    %152 = arith.divf %150, %151 : vector<8x40xf32>
    %153 = vector.extract_strided_slice %152 {offsets = [0, 0], sizes = [8, 10], strides = [1, 1]} : vector<8x40xf32> to vector<8x10xf32>
    %154 = vector.extract_strided_slice %152 {offsets = [0, 10], sizes = [8, 10], strides = [1, 1]} : vector<8x40xf32> to vector<8x10xf32>
    %155 = vector.extract_strided_slice %152 {offsets = [0, 30], sizes = [8, 10], strides = [1, 1]} : vector<8x40xf32> to vector<8x10xf32>
    %156 = vector.extract_strided_slice %147 {offsets = [0, 20], sizes = [8, 10], strides = [1, 1]} : vector<8x40xf32> to vector<8x10xf32>
    %157 = math.tanh %156 : vector<8x10xf32>
    %158 = arith.mulf %154, %123 : vector<8x10xf32>
    %159 = arith.mulf %153, %157 : vector<8x10xf32>
    %160 = arith.addf %158, %159 : vector<8x10xf32>
    %161 = math.tanh %160 : vector<8x10xf32>
    %162 = arith.mulf %155, %161 : vector<8x10xf32>
    %cst_31 = arith.constant dense<0.000000e+00> : vector<8x40xf32>
    %163 = tpu.matmul %143, %2, %cst_31 {dimension_numbers = #tpu.dot_dimension_numbers<[1], [0], [0], [1], [0, 0, 1, 1], [], []>} : vector<8x10xf32>, vector<10x40xf32>, vector<8x40xf32> -> vector<8x40xf32>
    %164 = vector.extract_strided_slice %13 {offsets = [32, 0], sizes = [8, 40], strides = [1, 1]} : vector<64x40xf32> to vector<8x40xf32>
    %165 = arith.addf %164, %163 : vector<8x40xf32>
    %166 = arith.negf %165 : vector<8x40xf32>
    %167 = math.exp %166 : vector<8x40xf32>
    %cst_32 = arith.constant 1.000000e+00 : f32
    %168 = vector.broadcast %cst_32 : f32 to vector<8x40xf32>
    %169 = arith.addf %168, %167 : vector<8x40xf32>
    %170 = arith.divf %168, %169 : vector<8x40xf32>
    %171 = vector.extract_strided_slice %170 {offsets = [0, 0], sizes = [8, 10], strides = [1, 1]} : vector<8x40xf32> to vector<8x10xf32>
    %172 = vector.extract_strided_slice %170 {offsets = [0, 10], sizes = [8, 10], strides = [1, 1]} : vector<8x40xf32> to vector<8x10xf32>
    %173 = vector.extract_strided_slice %170 {offsets = [0, 30], sizes = [8, 10], strides = [1, 1]} : vector<8x40xf32> to vector<8x10xf32>
    %174 = vector.extract_strided_slice %165 {offsets = [0, 20], sizes = [8, 10], strides = [1, 1]} : vector<8x40xf32> to vector<8x10xf32>
    %175 = math.tanh %174 : vector<8x10xf32>
    %176 = arith.mulf %172, %141 : vector<8x10xf32>
    %177 = arith.mulf %171, %175 : vector<8x10xf32>
    %178 = arith.addf %176, %177 : vector<8x10xf32>
    %179 = math.tanh %178 : vector<8x10xf32>
    %180 = arith.mulf %173, %179 : vector<8x10xf32>
    %cst_33 = arith.constant dense<0.000000e+00> : vector<8x40xf32>
    %181 = tpu.matmul %162, %4, %cst_33 {dimension_numbers = #tpu.dot_dimension_numbers<[1], [0], [0], [1], [0, 0, 1, 1], [], []>} : vector<8x10xf32>, vector<10x40xf32>, vector<8x40xf32> -> vector<8x40xf32>
    %cst_34 = arith.constant dense<0.000000e+00> : vector<8x40xf32>
    %182 = tpu.matmul %180, %3, %cst_34 {dimension_numbers = #tpu.dot_dimension_numbers<[1], [0], [0], [1], [0, 0, 1, 1], [], []>} : vector<8x10xf32>, vector<10x40xf32>, vector<8x40xf32> -> vector<8x40xf32>
    %183 = arith.addf %182, %181 : vector<8x40xf32>
    %184 = arith.addf %183, %7 : vector<8x40xf32>
    %185 = arith.negf %184 : vector<8x40xf32>
    %186 = math.exp %185 : vector<8x40xf32>
    %cst_35 = arith.constant 1.000000e+00 : f32
    %187 = vector.broadcast %cst_35 : f32 to vector<8x40xf32>
    %188 = arith.addf %187, %186 : vector<8x40xf32>
    %189 = arith.divf %187, %188 : vector<8x40xf32>
    %190 = vector.extract_strided_slice %189 {offsets = [0, 0], sizes = [8, 10], strides = [1, 1]} : vector<8x40xf32> to vector<8x10xf32>
    %191 = vector.extract_strided_slice %189 {offsets = [0, 10], sizes = [8, 10], strides = [1, 1]} : vector<8x40xf32> to vector<8x10xf32>
    %192 = vector.extract_strided_slice %189 {offsets = [0, 30], sizes = [8, 10], strides = [1, 1]} : vector<8x40xf32> to vector<8x10xf32>
    %193 = vector.extract_strided_slice %184 {offsets = [0, 20], sizes = [8, 10], strides = [1, 1]} : vector<8x40xf32> to vector<8x10xf32>
    %194 = math.tanh %193 : vector<8x10xf32>
    %195 = arith.mulf %191, %160 : vector<8x10xf32>
    %196 = arith.mulf %190, %194 : vector<8x10xf32>
    %197 = arith.addf %195, %196 : vector<8x10xf32>
    %198 = math.tanh %197 : vector<8x10xf32>
    %199 = arith.mulf %192, %198 : vector<8x10xf32>
    %cst_36 = arith.constant dense<0.000000e+00> : vector<8x40xf32>
    %200 = tpu.matmul %180, %2, %cst_36 {dimension_numbers = #tpu.dot_dimension_numbers<[1], [0], [0], [1], [0, 0, 1, 1], [], []>} : vector<8x10xf32>, vector<10x40xf32>, vector<8x40xf32> -> vector<8x40xf32>
    %201 = vector.extract_strided_slice %13 {offsets = [40, 0], sizes = [8, 40], strides = [1, 1]} : vector<64x40xf32> to vector<8x40xf32>
    %202 = arith.addf %201, %200 : vector<8x40xf32>
    %203 = arith.negf %202 : vector<8x40xf32>
    %204 = math.exp %203 : vector<8x40xf32>
    %cst_37 = arith.constant 1.000000e+00 : f32
    %205 = vector.broadcast %cst_37 : f32 to vector<8x40xf32>
    %206 = arith.addf %205, %204 : vector<8x40xf32>
    %207 = arith.divf %205, %206 : vector<8x40xf32>
    %208 = vector.extract_strided_slice %207 {offsets = [0, 0], sizes = [8, 10], strides = [1, 1]} : vector<8x40xf32> to vector<8x10xf32>
    %209 = vector.extract_strided_slice %207 {offsets = [0, 10], sizes = [8, 10], strides = [1, 1]} : vector<8x40xf32> to vector<8x10xf32>
    %210 = vector.extract_strided_slice %207 {offsets = [0, 30], sizes = [8, 10], strides = [1, 1]} : vector<8x40xf32> to vector<8x10xf32>
    %211 = vector.extract_strided_slice %202 {offsets = [0, 20], sizes = [8, 10], strides = [1, 1]} : vector<8x40xf32> to vector<8x10xf32>
    %212 = math.tanh %211 : vector<8x10xf32>
    %213 = arith.mulf %209, %178 : vector<8x10xf32>
    %214 = arith.mulf %208, %212 : vector<8x10xf32>
    %215 = arith.addf %213, %214 : vector<8x10xf32>
    %216 = math.tanh %215 : vector<8x10xf32>
    %217 = arith.mulf %210, %216 : vector<8x10xf32>
    %cst_38 = arith.constant dense<0.000000e+00> : vector<8x40xf32>
    %218 = tpu.matmul %199, %4, %cst_38 {dimension_numbers = #tpu.dot_dimension_numbers<[1], [0], [0], [1], [0, 0, 1, 1], [], []>} : vector<8x10xf32>, vector<10x40xf32>, vector<8x40xf32> -> vector<8x40xf32>
    %cst_39 = arith.constant dense<0.000000e+00> : vector<8x40xf32>
    %219 = tpu.matmul %217, %3, %cst_39 {dimension_numbers = #tpu.dot_dimension_numbers<[1], [0], [0], [1], [0, 0, 1, 1], [], []>} : vector<8x10xf32>, vector<10x40xf32>, vector<8x40xf32> -> vector<8x40xf32>
    %220 = arith.addf %219, %218 : vector<8x40xf32>
    %221 = arith.addf %220, %7 : vector<8x40xf32>
    %222 = arith.negf %221 : vector<8x40xf32>
    %223 = math.exp %222 : vector<8x40xf32>
    %cst_40 = arith.constant 1.000000e+00 : f32
    %224 = vector.broadcast %cst_40 : f32 to vector<8x40xf32>
    %225 = arith.addf %224, %223 : vector<8x40xf32>
    %226 = arith.divf %224, %225 : vector<8x40xf32>
    %227 = vector.extract_strided_slice %226 {offsets = [0, 0], sizes = [8, 10], strides = [1, 1]} : vector<8x40xf32> to vector<8x10xf32>
    %228 = vector.extract_strided_slice %226 {offsets = [0, 10], sizes = [8, 10], strides = [1, 1]} : vector<8x40xf32> to vector<8x10xf32>
    %229 = vector.extract_strided_slice %226 {offsets = [0, 30], sizes = [8, 10], strides = [1, 1]} : vector<8x40xf32> to vector<8x10xf32>
    %230 = vector.extract_strided_slice %221 {offsets = [0, 20], sizes = [8, 10], strides = [1, 1]} : vector<8x40xf32> to vector<8x10xf32>
    %231 = math.tanh %230 : vector<8x10xf32>
    %232 = arith.mulf %228, %197 : vector<8x10xf32>
    %233 = arith.mulf %227, %231 : vector<8x10xf32>
    %234 = arith.addf %232, %233 : vector<8x10xf32>
    %235 = math.tanh %234 : vector<8x10xf32>
    %236 = arith.mulf %229, %235 : vector<8x10xf32>
    %cst_41 = arith.constant dense<0.000000e+00> : vector<8x40xf32>
    %237 = tpu.matmul %217, %2, %cst_41 {dimension_numbers = #tpu.dot_dimension_numbers<[1], [0], [0], [1], [0, 0, 1, 1], [], []>} : vector<8x10xf32>, vector<10x40xf32>, vector<8x40xf32> -> vector<8x40xf32>
    %238 = vector.extract_strided_slice %13 {offsets = [48, 0], sizes = [8, 40], strides = [1, 1]} : vector<64x40xf32> to vector<8x40xf32>
    %239 = arith.addf %238, %237 : vector<8x40xf32>
    %240 = arith.negf %239 : vector<8x40xf32>
    %241 = math.exp %240 : vector<8x40xf32>
    %cst_42 = arith.constant 1.000000e+00 : f32
    %242 = vector.broadcast %cst_42 : f32 to vector<8x40xf32>
    %243 = arith.addf %242, %241 : vector<8x40xf32>
    %244 = arith.divf %242, %243 : vector<8x40xf32>
    %245 = vector.extract_strided_slice %244 {offsets = [0, 0], sizes = [8, 10], strides = [1, 1]} : vector<8x40xf32> to vector<8x10xf32>
    %246 = vector.extract_strided_slice %244 {offsets = [0, 10], sizes = [8, 10], strides = [1, 1]} : vector<8x40xf32> to vector<8x10xf32>
    %247 = vector.extract_strided_slice %244 {offsets = [0, 30], sizes = [8, 10], strides = [1, 1]} : vector<8x40xf32> to vector<8x10xf32>
    %248 = vector.extract_strided_slice %239 {offsets = [0, 20], sizes = [8, 10], strides = [1, 1]} : vector<8x40xf32> to vector<8x10xf32>
    %249 = math.tanh %248 : vector<8x10xf32>
    %250 = arith.mulf %246, %215 : vector<8x10xf32>
    %251 = arith.mulf %245, %249 : vector<8x10xf32>
    %252 = arith.addf %250, %251 : vector<8x10xf32>
    %253 = math.tanh %252 : vector<8x10xf32>
    %254 = arith.mulf %247, %253 : vector<8x10xf32>
    %cst_43 = arith.constant dense<0.000000e+00> : vector<8x40xf32>
    %255 = tpu.matmul %236, %4, %cst_43 {dimension_numbers = #tpu.dot_dimension_numbers<[1], [0], [0], [1], [0, 0, 1, 1], [], []>} : vector<8x10xf32>, vector<10x40xf32>, vector<8x40xf32> -> vector<8x40xf32>
    %cst_44 = arith.constant dense<0.000000e+00> : vector<8x40xf32>
    %256 = tpu.matmul %254, %3, %cst_44 {dimension_numbers = #tpu.dot_dimension_numbers<[1], [0], [0], [1], [0, 0, 1, 1], [], []>} : vector<8x10xf32>, vector<10x40xf32>, vector<8x40xf32> -> vector<8x40xf32>
    %257 = arith.addf %256, %255 : vector<8x40xf32>
    %258 = arith.addf %257, %7 : vector<8x40xf32>
    %259 = arith.negf %258 : vector<8x40xf32>
    %260 = math.exp %259 : vector<8x40xf32>
    %cst_45 = arith.constant 1.000000e+00 : f32
    %261 = vector.broadcast %cst_45 : f32 to vector<8x40xf32>
    %262 = arith.addf %261, %260 : vector<8x40xf32>
    %263 = arith.divf %261, %262 : vector<8x40xf32>
    %264 = vector.extract_strided_slice %263 {offsets = [0, 0], sizes = [8, 10], strides = [1, 1]} : vector<8x40xf32> to vector<8x10xf32>
    %265 = vector.extract_strided_slice %263 {offsets = [0, 10], sizes = [8, 10], strides = [1, 1]} : vector<8x40xf32> to vector<8x10xf32>
    %266 = vector.extract_strided_slice %263 {offsets = [0, 30], sizes = [8, 10], strides = [1, 1]} : vector<8x40xf32> to vector<8x10xf32>
    %267 = vector.extract_strided_slice %258 {offsets = [0, 20], sizes = [8, 10], strides = [1, 1]} : vector<8x40xf32> to vector<8x10xf32>
    %268 = math.tanh %267 : vector<8x10xf32>
    %269 = arith.mulf %265, %234 : vector<8x10xf32>
    %270 = arith.mulf %264, %268 : vector<8x10xf32>
    %271 = arith.addf %269, %270 : vector<8x10xf32>
    %272 = math.tanh %271 : vector<8x10xf32>
    %273 = arith.mulf %266, %272 : vector<8x10xf32>
    %cst_46 = arith.constant dense<0.000000e+00> : vector<8x40xf32>
    %274 = tpu.matmul %254, %2, %cst_46 {dimension_numbers = #tpu.dot_dimension_numbers<[1], [0], [0], [1], [0, 0, 1, 1], [], []>} : vector<8x10xf32>, vector<10x40xf32>, vector<8x40xf32> -> vector<8x40xf32>
    %275 = vector.extract_strided_slice %13 {offsets = [56, 0], sizes = [8, 40], strides = [1, 1]} : vector<64x40xf32> to vector<8x40xf32>
    %276 = arith.addf %275, %274 : vector<8x40xf32>
    %277 = arith.negf %276 : vector<8x40xf32>
    %278 = math.exp %277 : vector<8x40xf32>
    %cst_47 = arith.constant 1.000000e+00 : f32
    %279 = vector.broadcast %cst_47 : f32 to vector<8x40xf32>
    %280 = arith.addf %279, %278 : vector<8x40xf32>
    %281 = arith.divf %279, %280 : vector<8x40xf32>
    %282 = vector.extract_strided_slice %281 {offsets = [0, 0], sizes = [8, 10], strides = [1, 1]} : vector<8x40xf32> to vector<8x10xf32>
    %283 = vector.extract_strided_slice %281 {offsets = [0, 10], sizes = [8, 10], strides = [1, 1]} : vector<8x40xf32> to vector<8x10xf32>
    %284 = vector.extract_strided_slice %281 {offsets = [0, 30], sizes = [8, 10], strides = [1, 1]} : vector<8x40xf32> to vector<8x10xf32>
    %285 = vector.extract_strided_slice %276 {offsets = [0, 20], sizes = [8, 10], strides = [1, 1]} : vector<8x40xf32> to vector<8x10xf32>
    %286 = math.tanh %285 : vector<8x10xf32>
    %287 = arith.mulf %283, %252 : vector<8x10xf32>
    %288 = arith.mulf %282, %286 : vector<8x10xf32>
    %289 = arith.addf %287, %288 : vector<8x10xf32>
    %290 = math.tanh %289 : vector<8x10xf32>
    %291 = arith.mulf %284, %290 : vector<8x10xf32>
    %cst_48 = arith.constant dense<0.000000e+00> : vector<8x40xf32>
    %292 = tpu.matmul %273, %4, %cst_48 {dimension_numbers = #tpu.dot_dimension_numbers<[1], [0], [0], [1], [0, 0, 1, 1], [], []>} : vector<8x10xf32>, vector<10x40xf32>, vector<8x40xf32> -> vector<8x40xf32>
    %cst_49 = arith.constant dense<0.000000e+00> : vector<8x40xf32>
    %293 = tpu.matmul %291, %3, %cst_49 {dimension_numbers = #tpu.dot_dimension_numbers<[1], [0], [0], [1], [0, 0, 1, 1], [], []>} : vector<8x10xf32>, vector<10x40xf32>, vector<8x40xf32> -> vector<8x40xf32>
    %294 = arith.addf %293, %292 : vector<8x40xf32>
    %295 = arith.addf %294, %7 : vector<8x40xf32>
    %296 = arith.negf %295 : vector<8x40xf32>
    %297 = math.exp %296 : vector<8x40xf32>
    %cst_50 = arith.constant 1.000000e+00 : f32
    %298 = vector.broadcast %cst_50 : f32 to vector<8x40xf32>
    %299 = arith.addf %298, %297 : vector<8x40xf32>
    %300 = arith.divf %298, %299 : vector<8x40xf32>
    %301 = vector.extract_strided_slice %300 {offsets = [0, 0], sizes = [8, 10], strides = [1, 1]} : vector<8x40xf32> to vector<8x10xf32>
    %302 = vector.extract_strided_slice %300 {offsets = [0, 10], sizes = [8, 10], strides = [1, 1]} : vector<8x40xf32> to vector<8x10xf32>
    %303 = vector.extract_strided_slice %300 {offsets = [0, 30], sizes = [8, 10], strides = [1, 1]} : vector<8x40xf32> to vector<8x10xf32>
    %304 = vector.extract_strided_slice %295 {offsets = [0, 20], sizes = [8, 10], strides = [1, 1]} : vector<8x40xf32> to vector<8x10xf32>
    %305 = math.tanh %304 : vector<8x10xf32>
    %306 = arith.mulf %302, %271 : vector<8x10xf32>
    %307 = arith.mulf %301, %305 : vector<8x10xf32>
    %308 = arith.addf %306, %307 : vector<8x10xf32>
    %309 = math.tanh %308 : vector<8x10xf32>
    %310 = arith.mulf %303, %309 : vector<8x10xf32>
    %311 = vector.broadcast %8 : vector<1x10xf32> to vector<8x10xf32>
    %312 = arith.mulf %310, %311 : vector<8x10xf32>
    %cst_51 = arith.constant dense<0.000000e+00> : vector<8xf32>
    %313 = vector.multi_reduction <add>, %312, %cst_51 [1] : vector<8x10xf32> to vector<8xf32>
    %314 = vector.shape_cast %313 : vector<8xf32> to vector<8x1xf32>
    %315 = vector.broadcast %9 : vector<1x1xf32> to vector<8x1xf32>
    %316 = arith.addf %314, %315 : vector<8x1xf32>
    %c0_52 = arith.constant 0 : index
    %c0_53 = arith.constant 0 : index
    %317 = vector.load %arg2[%c0_52, %c0_53] : memref<8x1xf32, #tpu.memory_space<vmem>>, vector<8x1xf32>
    tpu.vector_store %arg2[%c0_52, %c0_53], %316 {strides = array<i32>} : memref<8x1xf32, #tpu.memory_space<vmem>>, vector<8x1xf32>,
    return
  }
}

</mosaic_0001>

<bundles_post_ra>
// kernel: tpu_custom_call.1
= control target key start
LH: loop header
LB: loop body
LE: loop exit
PB: predicated region body
PF: predicated region fallthrough
CT: control target
= control target key end

     0   :  { %vm57_vm0 = vcmask 1042432   ;;  %vm106_vm1 = vcmask 1041408   ;;  %vm32_vm2 = vcmask 23552   ;;  %v1511_v4 = vmov 0.0   ;;  %s1512_s19 = smov 108   ;;  %s1513_s20 = smov 10   ;;  %s1853_s1 = inlined_call_operand.vmem [shape: f32[88,40], index: 1, kind: input, shape index: {}]   ;;  %s1854_s0 = inlined_call_operand.vmem [shape: f32[64,3], index: 0, kind: input, shape index: {}]   ;;  %s1855_s2 = inlined_call_operand.vmem [shape: f32[8,1], index: 2, kind: output, shape index: {}]  }
   0x1   :  { %v11_v0 = vld [vmem:[%s1853_s1] sm:$0x7]  ;;  %v1538_v1 = vld [vmem:[%s1853_s1 + $0x18] sm:$0x3]  ;;  %v1548_v3 = vld [vmem:[%s1853_s1 + $0x10] sm:$0xff]  ;;  %s1514_s21 = smov 20  }
   0x2   :  { %v23_v2 = vld [vmem:[%s1854_s0] sm:$0xff]  ;;  %1300 = vmatpush.msk.msra.mxu0 %vm57_vm0, %v11_v0  ;;  %1309 = vmatpush.msk.msra.mxu1 %vm106_vm1, %v1538_v1  ;;  %v1561_v5 = vld [vmem:[%s1853_s1 + $0x8] ss:$0 sm:$0xff]  ;;  %v1573_v30 = vld [vmem:[%s1853_s1 + $0x38] sm:$0x3]  ;;  %s1515_s4 = smov 98  }
   0x3   :  { %1301 = vmatmul.msk.f32.vlgmr.msra.gmra.mxu0 %vm32_vm2, %v23_v2  ;;  %v1578_v31 = vld [vmem:[%s1853_s1 + $0x28] sm:$0x3]  ;;  %1311 = vmatpush.msk.msra.mxu2 %vm106_vm1, %v1573_v30  ;;  %v1590_v33 = vld [vmem:[%s1853_s1 + $0x30] sm:$0xff]  ;;  %v1595_v34 = vld [vmem:[%s1853_s1 + $0x20] sm:$0xff]  ;;  %vm102_vm7 = vcmask 80896   ;;  %s1516_s27 = smov 30  }
   0x4   :  { %125 = vmatpush.msra.mxu1 %v1548_v3  ;;  %v24_v32 = vld [vmem:[%s1854_s0 + $0x8] sm:$0xff]  ;;  %1312 = vmatpush.msk.msra.mxu3 %vm106_vm1, %v1578_v31  ;;  %v1621_v39 = vld [vmem:[%s1853_s1 + $0x40] ss:$0 sm:$0xff] }
   0x5   :  { %126 = vmatmul.f32.vlgmr.msra.gmra.mxu1 %v1511_v4  ;;  %186 = vmatpush.msra.mxu2 %v1590_v33 }
   0x6   :  { %1315 = vmatpush.msk.msrb.mxu1 %vm106_vm1, %v1538_v1  ;;  %214 = vmatpush.msra.mxu3 %v1595_v34 }
   0x7   :  { %187 = vmatmul.f32.vlgmr.msra.gmra.mxu2 %v1511_v4 }
   0x8   :  { %272 = vmatpush.msrb.mxu1 %v1548_v3  ;;  %1320 = vmatpush.msk.msrb.mxu3 %vm106_vm1, %v1578_v31 }
   0x9   :  { %1318 = vmatpush.msk.msrb.mxu2 %vm106_vm1, %v1573_v30 }
   0xa   :  { %1323 = vmatpush.msk.msra.mxu1 %vm106_vm1, %v1538_v1  ;;  %360 = vmatpush.msrb.mxu3 %v1595_v34 }
   0xb   :  { %1302 = vmatmul.msk.f32.gmra.mxu0 %vm32_vm2, %v24_v32  ;;  %335 = vmatpush.msrb.mxu2 %v1590_v33 }
   0xc   :  { %418 = vmatpush.msra.mxu1 %v1548_v3 }
   0xd   :  { %1326 = vmatpush.msk.msra.mxu2 %vm106_vm1, %v1573_v30 }
   0xf   :  { %481 = vmatpush.msra.mxu2 %v1590_v33 }
  0x80   :  { %v78_v6 = vpop.f32.mrf.mxu0 }
  0x81   :  { %v79_v7 = vadd.f32 %v1561_v5, %v78_v6 }
  0x82   :  { %v127_v8 = vpop.f32.mrf.mxu1 }
  0x83   :  { %v130_v9 = vadd.f32 %v127_v8, %v79_v7 }
  0x85   :  { %1381 = vtanh.f32 %v130_v9  ;;  %v1310_v11 = vmul.f32 -1.442695, %v130_v9 }
  0x87   :  { %1383 = vpow2.f32 %v1310_v11 }
  0x88   :  { %v81_v42 = vpop.f32.mrf.mxu0 }
  0x89   :  { %v82_v44 = vadd.f32 %v1561_v5, %v81_v42 }
  0x8a   :  { %v188_v38 = vpop.f32.mrf.mxu2 }
  0x8b   :  { %v1382_v10 = vpop.eup %1381 }
  0x8c   :  { %153 = vrot.lane.b32.xlu0 %v1382_v10, %s1512_s19 }
  0x8d   :  { %v1384_v12 = vpop.eup %1383 }
  0x8e   :  { %v134_v13 = vadd.f32 1.0, %v1384_v12 }
  0x90   :  { %1385 = vrcp.f32 %v134_v13  ;;  %v146_v19 = vand.u32 2147483648, %v134_v13  ;;  %vm140_vm4 = vweird.f32 %v134_v13  ;;  %v144_v20 = vand.u32 2147483647, %v134_v13 }
  0x92   :  { %v147_v22 = vor.u32 1.1754944e-38, %v146_v19  ;;  %vm145_vm6 = vcmp.eq.f32.partialorder %v144_v20, 8.507059e+37 }
  0x96   :  { %v1386_v14 = vpop.eup %1385 }
  0x97   :  { %v136_v15 = vmul.f32 %v1386_v14, %v134_v13  ;;  %vm141_vm3 = vweird.f32 %v1386_v14 }
  0x98   :  { %vm142_vm5 = vmor %vm140_vm4, %vm141_vm3 }
  0x99   :  { %v137_v16 = vsub.f32 1.0, %v136_v15 }
  0x9b   :  { %v138_v17 = vmul.f32 %v1386_v14, %v137_v16 }
  0x9d   :  { %v139_v18 = vadd.f32 %v1386_v14, %v138_v17 }
  0x9f   :  { %v143_v21 = vsel %vm142_vm5, %v1386_v14, %v139_v18 }
  0xa0   :  { %v148_v24 = vsel %vm145_vm6, %v147_v22, %v143_v21 }
  0xa1   :  { %v151_v26 = vmul.f32 0.0, %v148_v24 }
  0xfe   :  { %v154_v23 = vpop.permute.xlu0 %153 }
  0xff   :  { %v156_v25 = vmul.f32 %v154_v23, %v148_v24 }
 0x101   :  { %158 = vrot.lane.b32.xlu0 %v156_v25, %s1513_s20 }
 0x173   :  { %v159_v27 = vpop.permute.xlu0 %158 }
 0x174   :  { %v1566_v28 = vadd.f32 %v159_v27, %v151_v26 }
 0x176   :  { %1387 = vtanh.f32 %v1566_v28 }
 0x17c   :  { %v1388_v29 = vpop.eup %1387 }
 0x17d   :  { %164 = vrot.lane.b32.xlu1 %v1388_v29, %s1514_s21 }
 0x1ef   :  { %v165_v35 = vpop.permute.xlu1 %164 }
 0x1f0   :  { %v167_v36 = vmul.f32 %v165_v35, %v148_v24 }
 0x1f2   :  { %192 = vrot.lane.b32.xlu1 %v167_v36, %s1515_s4 }
 0x264   :  { %v193_v37 = vpop.permute.xlu1 %192 }
 0x265   :  { %1313 = vmatmul.msk.f32.vlgmr.msra.gmra.mxu3 %vm102_vm7, %v193_v37  ;;  %1316 = vmatmul.msk.f32.vlgmr.msrb.gmra.mxu1 %vm102_vm7, %v193_v37 }
 0x266   :  { %1331 = vmatpush.msk.msrb.mxu1 %vm106_vm1, %v1538_v1  ;;  %1328 = vmatpush.msk.msra.mxu3 %vm106_vm1, %v1578_v31 }
 0x268   :  { %564 = vmatpush.msrb.mxu1 %v1548_v3  ;;  %506 = vmatpush.msra.mxu3 %v1595_v34 }
 0x2e2   :  { %v274_v45 = vpop.f32.mrf.mxu1 }
 0x2e3   :  { %v277_v46 = vadd.f32 %v274_v45, %v82_v44 }
 0x2e5   :  { %v1317_v50 = vmul.f32 -1.442695, %v277_v46 }
 0x2e8   :  { %v216_v40 = vpop.f32.mrf.mxu3 }
 0x2e9   :  { %v217_v41 = vadd.f32 %v216_v40, %v188_v38 }
 0x2eb   :  { %v219_v43 = vadd.f32 %v1621_v39, %v217_v41 }
 0x2ed   :  { %1389 = vtanh.f32 %v219_v43  ;;  %v1314_v49 = vmul.f32 -1.442695, %v219_v43 }
 0x2ee   :  { %1391 = vtanh.f32 %v277_v46 }
 0x2ef   :  { %1393 = vpow2.f32 %v1314_v49 }
 0x2f0   :  { %1395 = vpow2.f32 %v1317_v50 }
 0x2f3   :  { %v1390_v47 = vpop.eup %1389 }
 0x2f4   :  { %242 = vrot.lane.b32.xlu2 %v1390_v47, %s1512_s19  ;;  %v1392_v48 = vpop.eup %1391 }
 0x2f5   :  { %v1394_v51 = vpop.eup %1393 }
 0x2f6   :  { %v223_v52 = vadd.f32 1.0, %v1394_v51  ;;  %v1396_v53 = vpop.eup %1395 }
 0x2f7   :  { %v281_v54 = vadd.f32 1.0, %v1396_v53 }
 0x2f8   :  { %1397 = vrcp.f32 %v223_v52  ;;  %v235_v63 = vand.u32 2147483648, %v223_v52  ;;  %vm229_vm9 = vweird.f32 %v223_v52  ;;  %v233_v0 = vand.u32 2147483647, %v223_v52 }
 0x2f9   :  { %1399 = vrcp.f32 %v281_v54  ;;  %v293_v11 = vand.u32 2147483648, %v281_v54  ;;  %vm287_vm13 = vweird.f32 %v281_v54  ;;  %v291_v12 = vand.u32 2147483647, %v281_v54 }
 0x2fa   :  { %v236_v6 = vor.u32 1.1754944e-38, %v235_v63  ;;  %vm234_vm11 = vcmp.eq.f32.partialorder %v233_v0, 8.507059e+37 }
 0x2fb   :  { %v294_v14 = vor.u32 1.1754944e-38, %v293_v11  ;;  %vm292_vm15 = vcmp.eq.f32.partialorder %v291_v12, 8.507059e+37 }
 0x2fc   :  { %300 = vrot.lane.b32.xlu2 %v1392_v48, %s1512_s19 }
 0x2fe   :  { %v1398_v55 = vpop.eup %1397 }
 0x2ff   :  { %v225_v56 = vmul.f32 %v1398_v55, %v223_v52  ;;  %v1400_v58 = vpop.eup %1399  ;;  %vm230_vm8 = vweird.f32 %v1398_v55 }
 0x300   :  { %v283_v60 = vmul.f32 %v1400_v58, %v281_v54  ;;  %vm231_vm10 = vmor %vm229_vm9, %vm230_vm8  ;;  %vm288_vm12 = vweird.f32 %v1400_v58 }
 0x301   :  { %v226_v57 = vsub.f32 1.0, %v225_v56  ;;  %vm289_vm14 = vmor %vm287_vm13, %vm288_vm12 }
 0x302   :  { %v284_v62 = vsub.f32 1.0, %v283_v60 }
 0x303   :  { %v227_v59 = vmul.f32 %v1398_v55, %v226_v57 }
 0x304   :  { %v285_v4 = vmul.f32 %v1400_v58, %v284_v62 }
 0x305   :  { %v228_v61 = vadd.f32 %v1398_v55, %v227_v59 }
 0x306   :  { %v286_v10 = vadd.f32 %v1400_v58, %v285_v4 }
 0x307   :  { %v232_v2 = vsel %vm231_vm10, %v1398_v55, %v228_v61 }
 0x308   :  { %v237_v8 = vsel %vm234_vm11, %v236_v6, %v232_v2  ;;  %v290_v13 = vsel %vm289_vm14, %v1400_v58, %v286_v10 }
 0x309   :  { %v295_v15 = vsel %vm292_vm15, %v294_v14, %v290_v13  ;;  %v240_v18 = vmul.f32 0.0, %v237_v8 }
 0x30a   :  { %v298_v21 = vmul.f32 %v295_v15, %v1566_v28  ;;  %v25_v28 = vld [vmem:[%s1854_s0 + $0x10] sm:$0xff] }
 0x30b   :  { %1303 = vmatmul.msk.f32.gmra.mxu0 %vm32_vm2, %v25_v28 }
 0x34e   :  { %v243_v7 = vpop.permute.xlu2 %242 }
 0x34f   :  { %v245_v9 = vmul.f32 %v243_v7, %v237_v8 }
 0x351   :  { %247 = vrot.lane.b32.xlu0 %v245_v9, %s1513_s20 }
 0x356   :  { %v301_v16 = vpop.permute.xlu2 %300 }
 0x357   :  { %v303_v17 = vmul.f32 %v301_v16, %v295_v15 }
 0x359   :  { %305 = vrot.lane.b32.xlu1 %v303_v17, %s1513_s20 }
 0x388   :  { %v84_v37 = vpop.f32.mrf.mxu0 }
 0x389   :  { %v85_v38 = vadd.f32 %v1561_v5, %v84_v37 }
 0x3c3   :  { %v248_v19 = vpop.permute.xlu0 %247 }
 0x3c4   :  { %v1629_v20 = vadd.f32 %v248_v19, %v240_v18 }
 0x3c6   :  { %1401 = vtanh.f32 %v1629_v20 }
 0x3cb   :  { %v306_v22 = vpop.permute.xlu1 %305 }
 0x3cc   :  { %v1402_v23 = vpop.eup %1401  ;;  %v1633_v24 = vadd.f32 %v306_v22, %v298_v21 }
 0x3cd   :  { %253 = vrot.lane.b32.xlu2 %v1402_v23, %s1514_s21 }
 0x3ce   :  { %1403 = vtanh.f32 %v1633_v24 }
 0x3d4   :  { %v1404_v25 = vpop.eup %1403 }
 0x3d5   :  { %311 = vrot.lane.b32.xlu0 %v1404_v25, %s1514_s21 }
 0x427   :  { %v254_v26 = vpop.permute.xlu2 %253 }
 0x428   :  { %v256_v27 = vmul.f32 %v254_v26, %v237_v8 }
 0x42a   :  { %316 = vrot.lane.b32.xlu1 %v256_v27, %s1515_s4 }
 0x447   :  { %v312_v29 = vpop.permute.xlu0 %311 }
 0x448   :  { %v314_v32 = vmul.f32 %v312_v29, %v295_v15 }
 0x44a   :  { %341 = vrot.lane.b32.xlu2 %v314_v32, %s1515_s4 }
 0x49c   :  { %v317_v35 = vpop.permute.xlu1 %316 }
 0x49d   :  { %1319 = vmatmul.msk.f32.vlgmr.msrb.gmra.mxu2 %vm102_vm7, %v317_v35 }
 0x49e   :  { %1334 = vmatpush.msk.msrb.mxu2 %vm106_vm1, %v1573_v30 }
 0x4a0   :  { %627 = vmatpush.msrb.mxu2 %v1590_v33 }
 0x4a4   :  { %v342_v36 = vpop.permute.xlu2 %341 }
 0x4a5   :  { %1321 = vmatmul.msk.f32.vlgmr.msrb.gmra.mxu3 %vm102_vm7, %v342_v36  ;;  %1324 = vmatmul.msk.f32.vlgmr.msra.gmra.mxu1 %vm102_vm7, %v342_v36 }
 0x4a6   :  { %1336 = vmatpush.msk.msrb.mxu3 %vm106_vm1, %v1578_v31  ;;  %1339 = vmatpush.msk.msra.mxu1 %vm106_vm1, %v1538_v1 }
 0x4a8   :  { %652 = vmatpush.msrb.mxu3 %v1595_v34  ;;  %710 = vmatpush.msra.mxu1 %v1548_v3 }
 0x520   :  { %v337_v42 = vpop.f32.mrf.mxu2 }
 0x522   :  { %v420_v40 = vpop.f32.mrf.mxu1 }
 0x523   :  { %v423_v41 = vadd.f32 %v420_v40, %v85_v38 }
 0x525   :  { %1405 = vtanh.f32 %v423_v41  ;;  %v1325_v48 = vmul.f32 -1.442695, %v423_v41 }
 0x528   :  { %v362_v43 = vpop.f32.mrf.mxu3 }
 0x529   :  { %v363_v44 = vadd.f32 %v362_v43, %v337_v42 }
 0x52b   :  { %v1406_v45 = vpop.eup %1405  ;;  %v365_v46 = vadd.f32 %v1621_v39, %v363_v44 }
 0x52c   :  { %446 = vrot.lane.b32.xlu1 %v1406_v45, %s1512_s19 }
 0x52d   :  { %1407 = vtanh.f32 %v365_v46  ;;  %v1322_v49 = vmul.f32 -1.442695, %v365_v46 }
 0x52e   :  { %1409 = vpow2.f32 %v1325_v48 }
 0x52f   :  { %1411 = vpow2.f32 %v1322_v49 }
 0x533   :  { %v1408_v47 = vpop.eup %1407 }
 0x534   :  { %388 = vrot.lane.b32.xlu0 %v1408_v47, %s1512_s19  ;;  %v1410_v50 = vpop.eup %1409 }
 0x535   :  { %v427_v51 = vadd.f32 1.0, %v1410_v50  ;;  %v1412_v52 = vpop.eup %1411 }
 0x536   :  { %v369_v53 = vadd.f32 1.0, %v1412_v52 }
 0x537   :  { %1413 = vrcp.f32 %v427_v51  ;;  %v439_v62 = vand.u32 2147483648, %v427_v51  ;;  %vm433_vm3 = vweird.f32 %v427_v51  ;;  %v437_v63 = vand.u32 2147483647, %v427_v51 }
 0x538   :  { %1415 = vrcp.f32 %v369_v53  ;;  %v381_v10 = vand.u32 2147483648, %v369_v53  ;;  %vm375_vm8 = vweird.f32 %v369_v53  ;;  %v379_v11 = vand.u32 2147483647, %v369_v53 }
 0x539   :  { %v440_v4 = vor.u32 1.1754944e-38, %v439_v62  ;;  %vm438_vm5 = vcmp.eq.f32.partialorder %v437_v63, 8.507059e+37 }
 0x53a   :  { %v382_v13 = vor.u32 1.1754944e-38, %v381_v10  ;;  %vm380_vm10 = vcmp.eq.f32.partialorder %v379_v11, 8.507059e+37 }
 0x53d   :  { %v1414_v54 = vpop.eup %1413 }
 0x53e   :  { %v429_v55 = vmul.f32 %v1414_v54, %v427_v51  ;;  %v1416_v57 = vpop.eup %1415  ;;  %vm434_vm0 = vweird.f32 %v1414_v54 }
 0x53f   :  { %v371_v59 = vmul.f32 %v1416_v57, %v369_v53  ;;  %vm435_vm4 = vmor %vm433_vm3, %vm434_vm0  ;;  %vm376_vm6 = vweird.f32 %v1416_v57 }
 0x540   :  { %v430_v56 = vsub.f32 1.0, %v429_v55  ;;  %vm377_vm9 = vmor %vm375_vm8, %vm376_vm6 }
 0x541   :  { %v372_v61 = vsub.f32 1.0, %v371_v59 }
 0x542   :  { %v431_v58 = vmul.f32 %v1414_v54, %v430_v56 }
 0x543   :  { %v373_v2 = vmul.f32 %v1416_v57, %v372_v61 }
 0x544   :  { %v432_v60 = vadd.f32 %v1414_v54, %v431_v58 }
 0x545   :  { %v374_v9 = vadd.f32 %v1416_v57, %v373_v2 }
 0x546   :  { %v436_v0 = vsel %vm435_vm4, %v1414_v54, %v432_v60 }
 0x547   :  { %v441_v7 = vsel %vm438_vm5, %v440_v4, %v436_v0  ;;  %v378_v12 = vsel %vm377_vm9, %v1416_v57, %v374_v9 }
 0x548   :  { %v383_v15 = vsel %vm380_vm10, %v382_v13, %v378_v12  ;;  %v444_v22 = vmul.f32 %v441_v7, %v1633_v24 }
 0x549   :  { %v386_v17 = vmul.f32 %v383_v15, %v1629_v20  ;;  %v26_v20 = vld [vmem:[%s1854_s0 + $0x18] sm:$0xff] }
 0x54a   :  { %1304 = vmatmul.msk.f32.gmra.mxu0 %vm32_vm2, %v26_v20 }
 0x59e   :  { %v447_v6 = vpop.permute.xlu1 %446 }
 0x59f   :  { %v449_v8 = vmul.f32 %v447_v6, %v441_v7 }
 0x5a1   :  { %451 = vrot.lane.b32.xlu0 %v449_v8, %s1513_s20 }
 0x5a6   :  { %v389_v14 = vpop.permute.xlu0 %388 }
 0x5a7   :  { %v391_v16 = vmul.f32 %v389_v14, %v383_v15 }
 0x5a9   :  { %393 = vrot.lane.b32.xlu2 %v391_v16, %s1513_s20 }
 0x5c7   :  { %v87_v36 = vpop.f32.mrf.mxu0 }
 0x5c8   :  { %v88_v37 = vadd.f32 %v1561_v5, %v87_v36 }
 0x603   :  { %v394_v18 = vpop.permute.xlu2 %393 }
 0x604   :  { %v1663_v19 = vadd.f32 %v394_v18, %v386_v17 }
 0x606   :  { %1417 = vtanh.f32 %v1663_v19 }
 0x60c   :  { %v1418_v21 = vpop.eup %1417 }
 0x60d   :  { %399 = vrot.lane.b32.xlu1 %v1418_v21, %s1514_s21 }
 0x613   :  { %v452_v23 = vpop.permute.xlu0 %451 }
 0x614   :  { %v1668_v25 = vadd.f32 %v452_v23, %v444_v22 }
 0x616   :  { %1419 = vtanh.f32 %v1668_v25 }
 0x61c   :  { %v1420_v26 = vpop.eup %1419 }
 0x61d   :  { %457 = vrot.lane.b32.xlu2 %v1420_v26, %s1514_s21 }
 0x677   :  { %v458_v27 = vpop.permute.xlu2 %457 }
 0x678   :  { %v460_v29 = vmul.f32 %v458_v27, %v441_v7 }
 0x67a   :  { %487 = vrot.lane.b32.xlu1 %v460_v29, %s1515_s4 }
 0x67f   :  { %v400_v32 = vpop.permute.xlu1 %399 }
 0x680   :  { %v402_v24 = vmul.f32 %v400_v32, %v383_v15 }
 0x682   :  { %462 = vrot.lane.b32.xlu0 %v402_v24, %s1515_s4 }
 0x6ec   :  { %v488_v28 = vpop.permute.xlu1 %487 }
 0x6ed   :  { %1329 = vmatmul.msk.f32.vlgmr.msra.gmra.mxu3 %vm102_vm7, %v488_v28  ;;  %1332 = vmatmul.msk.f32.vlgmr.msrb.gmra.mxu1 %vm102_vm7, %v488_v28 }
 0x6ee   :  { %1344 = vmatpush.msk.msra.mxu3 %vm106_vm1, %v1578_v31  ;;  %1347 = vmatpush.msk.msrb.mxu1 %vm106_vm1, %v1538_v1 }
 0x6f0   :  { %798 = vmatpush.msra.mxu3 %v1595_v34  ;;  %856 = vmatpush.msrb.mxu1 %v1548_v3 }
 0x6f4   :  { %v463_v35 = vpop.permute.xlu0 %462 }
 0x6f5   :  { %1327 = vmatmul.msk.f32.vlgmr.msra.gmra.mxu2 %vm102_vm7, %v463_v35 }
 0x6f6   :  { %1342 = vmatpush.msk.msra.mxu2 %vm106_vm1, %v1573_v30 }
 0x6f8   :  { %773 = vmatpush.msra.mxu2 %v1590_v33 }
 0x76a   :  { %v566_v38 = vpop.f32.mrf.mxu1 }
 0x76b   :  { %v569_v40 = vadd.f32 %v566_v38, %v88_v37 }
 0x76d   :  { %1421 = vtanh.f32 %v569_v40  ;;  %v1333_v48 = vmul.f32 -1.442695, %v569_v40 }
 0x770   :  { %v508_v42 = vpop.f32.mrf.mxu3 }
 0x773   :  { %v1422_v41 = vpop.eup %1421 }
 0x774   :  { %592 = vrot.lane.b32.xlu0 %v1422_v41, %s1512_s19 }
 0x778   :  { %v483_v43 = vpop.f32.mrf.mxu2 }
 0x779   :  { %v509_v44 = vadd.f32 %v508_v42, %v483_v43 }
 0x77b   :  { %v511_v45 = vadd.f32 %v1621_v39, %v509_v44 }
 0x77d   :  { %1423 = vtanh.f32 %v511_v45  ;;  %v1330_v47 = vmul.f32 -1.442695, %v511_v45 }
 0x77f   :  { %1425 = vpow2.f32 %v1330_v47 }
 0x780   :  { %1427 = vpow2.f32 %v1333_v48 }
 0x783   :  { %v1424_v46 = vpop.eup %1423 }
 0x784   :  { %534 = vrot.lane.b32.xlu2 %v1424_v46, %s1512_s19 }
 0x785   :  { %v1426_v49 = vpop.eup %1425 }
 0x786   :  { %v515_v50 = vadd.f32 1.0, %v1426_v49  ;;  %v1428_v51 = vpop.eup %1427 }
 0x787   :  { %v573_v52 = vadd.f32 1.0, %v1428_v51 }
 0x788   :  { %1429 = vrcp.f32 %v515_v50  ;;  %v527_v61 = vand.u32 2147483648, %v515_v50  ;;  %vm521_vm12 = vweird.f32 %v515_v50  ;;  %v525_v62 = vand.u32 2147483647, %v515_v50 }
 0x789   :  { %1431 = vrcp.f32 %v573_v52  ;;  %v585_v9 = vand.u32 2147483648, %v573_v52  ;;  %vm579_vm0 = vweird.f32 %v573_v52  ;;  %v583_v10 = vand.u32 2147483647, %v573_v52 }
 0x78a   :  { %v528_v2 = vor.u32 1.1754944e-38, %v527_v61  ;;  %vm526_vm14 = vcmp.eq.f32.partialorder %v525_v62, 8.507059e+37 }
 0x78b   :  { %v586_v12 = vor.u32 1.1754944e-38, %v585_v9  ;;  %vm584_vm4 = vcmp.eq.f32.partialorder %v583_v10, 8.507059e+37 }
 0x78e   :  { %v1430_v53 = vpop.eup %1429 }
 0x78f   :  { %v517_v54 = vmul.f32 %v1430_v53, %v515_v50  ;;  %v1432_v56 = vpop.eup %1431  ;;  %vm522_vm11 = vweird.f32 %v1430_v53 }
 0x790   :  { %v575_v58 = vmul.f32 %v1432_v56, %v573_v52  ;;  %vm523_vm13 = vmor %vm521_vm12, %vm522_vm11  ;;  %vm580_vm15 = vweird.f32 %v1432_v56 }
 0x791   :  { %v518_v55 = vsub.f32 1.0, %v517_v54  ;;  %vm581_vm3 = vmor %vm579_vm0, %vm580_vm15 }
 0x792   :  { %v576_v60 = vsub.f32 1.0, %v575_v58 }
 0x793   :  { %v519_v57 = vmul.f32 %v1430_v53, %v518_v55 }
 0x794   :  { %v577_v0 = vmul.f32 %v1432_v56, %v576_v60 }
 0x795   :  { %v520_v59 = vadd.f32 %v1430_v53, %v519_v57 }
 0x796   :  { %v578_v8 = vadd.f32 %v1432_v56, %v577_v0 }
 0x797   :  { %v524_v63 = vsel %vm523_vm13, %v1430_v53, %v520_v59 }
 0x798   :  { %v529_v6 = vsel %vm526_vm14, %v528_v2, %v524_v63  ;;  %v582_v11 = vsel %vm581_vm3, %v1432_v56, %v578_v8 }
 0x799   :  { %v587_v14 = vsel %vm584_vm4, %v586_v12, %v582_v11  ;;  %v532_v22 = vmul.f32 %v529_v6, %v1663_v19  ;;  %v27_v19 = vld [vmem:[%s1854_s0 + $0x20] sm:$0xff] }
 0x79a   :  { %v590_v16 = vmul.f32 %v587_v14, %v1668_v25  ;;  %1305 = vmatmul.msk.f32.gmra.mxu0 %vm32_vm2, %v27_v19 }
 0x7de   :  { %v535_v4 = vpop.permute.xlu2 %534 }
 0x7df   :  { %v537_v7 = vmul.f32 %v535_v4, %v529_v6 }
 0x7e1   :  { %539 = vrot.lane.b32.xlu1 %v537_v7, %s1513_s20 }
 0x7e6   :  { %v593_v13 = vpop.permute.xlu0 %592 }
 0x7e7   :  { %v595_v15 = vmul.f32 %v593_v13, %v587_v14 }
 0x7e9   :  { %597 = vrot.lane.b32.xlu2 %v595_v15, %s1513_s20 }
 0x817   :  { %v90_v35 = vpop.f32.mrf.mxu0 }
 0x818   :  { %v91_v36 = vadd.f32 %v1561_v5, %v90_v35 }
 0x843   :  { %v598_v17 = vpop.permute.xlu2 %597 }
 0x844   :  { %v1697_v18 = vadd.f32 %v598_v17, %v590_v16 }
 0x846   :  { %1433 = vtanh.f32 %v1697_v18 }
 0x84c   :  { %v1434_v21 = vpop.eup %1433 }
 0x84d   :  { %603 = vrot.lane.b32.xlu1 %v1434_v21, %s1514_s21 }
 0x853   :  { %v540_v23 = vpop.permute.xlu1 %539 }
 0x854   :  { %v1702_v26 = vadd.f32 %v540_v23, %v532_v22 }
 0x856   :  { %1435 = vtanh.f32 %v1702_v26 }
 0x85c   :  { %v1436_v20 = vpop.eup %1435 }
 0x85d   :  { %545 = vrot.lane.b32.xlu0 %v1436_v20, %s1514_s21 }
 0x8bf   :  { %v604_v27 = vpop.permute.xlu1 %603 }
 0x8c0   :  { %v606_v25 = vmul.f32 %v604_v27, %v587_v14 }
 0x8c2   :  { %633 = vrot.lane.b32.xlu0 %v606_v25, %s1515_s4 }
 0x8cf   :  { %v546_v29 = vpop.permute.xlu0 %545 }
 0x8d0   :  { %v548_v32 = vmul.f32 %v546_v29, %v529_v6 }
 0x8d2   :  { %608 = vrot.lane.b32.xlu2 %v548_v32, %s1515_s4 }
 0x92c   :  { %v609_v24 = vpop.permute.xlu2 %608 }
 0x92d   :  { %1335 = vmatmul.msk.f32.vlgmr.msrb.gmra.mxu2 %vm102_vm7, %v609_v24 }
 0x92e   :  { %1350 = vmatpush.msk.msrb.mxu2 %vm106_vm1, %v1573_v30 }
 0x930   :  { %919 = vmatpush.msrb.mxu2 %v1590_v33 }
 0x934   :  { %v634_v28 = vpop.permute.xlu0 %633 }
 0x935   :  { %1337 = vmatmul.msk.f32.vlgmr.msrb.gmra.mxu3 %vm102_vm7, %v634_v28  ;;  %1340 = vmatmul.msk.f32.vlgmr.msra.gmra.mxu1 %vm102_vm7, %v634_v28 }
 0x936   :  { %1352 = vmatpush.msk.msrb.mxu3 %vm106_vm1, %v1578_v31  ;;  %1355 = vmatpush.msk.msra.mxu1 %vm106_vm1, %v1538_v1 }
 0x938   :  { %944 = vmatpush.msrb.mxu3 %v1595_v34  ;;  %1002 = vmatpush.msra.mxu1 %v1548_v3 }
 0x9b0   :  { %v629_v40 = vpop.f32.mrf.mxu2 }
 0x9b2   :  { %v712_v37 = vpop.f32.mrf.mxu1 }
 0x9b3   :  { %v715_v38 = vadd.f32 %v712_v37, %v91_v36 }
 0x9b5   :  { %1437 = vtanh.f32 %v715_v38  ;;  %v1341_v46 = vmul.f32 -1.442695, %v715_v38 }
 0x9b8   :  { %v654_v41 = vpop.f32.mrf.mxu3 }
 0x9b9   :  { %v655_v42 = vadd.f32 %v654_v41, %v629_v40 }
 0x9bb   :  { %v1438_v43 = vpop.eup %1437  ;;  %v657_v44 = vadd.f32 %v1621_v39, %v655_v42 }
 0x9bc   :  { %738 = vrot.lane.b32.xlu2 %v1438_v43, %s1512_s19 }
 0x9bd   :  { %1439 = vtanh.f32 %v657_v44  ;;  %v1338_v52 = vmul.f32 -1.442695, %v657_v44 }
 0x9be   :  { %1441 = vpow2.f32 %v1341_v46 }
 0x9c3   :  { %v1440_v45 = vpop.eup %1439 }
 0x9c4   :  { %680 = vrot.lane.b32.xlu1 %v1440_v45, %s1512_s19  ;;  %v1442_v47 = vpop.eup %1441 }
 0x9c5   :  { %v719_v48 = vadd.f32 1.0, %v1442_v47 }
 0x9c7   :  { %1443 = vrcp.f32 %v719_v48  ;;  %v731_v55 = vand.u32 2147483648, %v719_v48  ;;  %vm725_vm6 = vweird.f32 %v719_v48  ;;  %v729_v56 = vand.u32 2147483647, %v719_v48 }
 0x9c8   :  { %1445 = vpow2.f32 %v1338_v52 }
 0x9c9   :  { %v732_v59 = vor.u32 1.1754944e-38, %v731_v55  ;;  %vm730_vm9 = vcmp.eq.f32.partialorder %v729_v56, 8.507059e+37 }
 0x9cd   :  { %v1444_v49 = vpop.eup %1443 }
 0x9ce   :  { %v721_v50 = vmul.f32 %v1444_v49, %v719_v48  ;;  %vm726_vm5 = vweird.f32 %v1444_v49  ;;  %v1446_v57 = vpop.eup %1445 }
 0x9cf   :  { %vm727_vm8 = vmor %vm725_vm6, %vm726_vm5  ;;  %v661_v60 = vadd.f32 1.0, %v1446_v57 }
 0x9d0   :  { %v722_v51 = vsub.f32 1.0, %v721_v50 }
 0x9d1   :  { %1447 = vrcp.f32 %v661_v60  ;;  %v673_v8 = vand.u32 2147483648, %v661_v60  ;;  %vm667_vm11 = vweird.f32 %v661_v60  ;;  %v671_v9 = vand.u32 2147483647, %v661_v60 }
 0x9d2   :  { %v723_v53 = vmul.f32 %v1444_v49, %v722_v51 }
 0x9d3   :  { %v674_v11 = vor.u32 1.1754944e-38, %v673_v8  ;;  %vm672_vm13 = vcmp.eq.f32.partialorder %v671_v9, 8.507059e+37 }
 0x9d4   :  { %v724_v54 = vadd.f32 %v1444_v49, %v723_v53 }
 0x9d6   :  { %v728_v58 = vsel %vm727_vm8, %v1444_v49, %v724_v54 }
 0x9d7   :  { %v733_v62 = vsel %vm730_vm9, %v732_v59, %v728_v58  ;;  %v1448_v0 = vpop.eup %1447 }
 0x9d8   :  { %v663_v2 = vmul.f32 %v1448_v0, %v661_v60  ;;  %vm668_vm10 = vweird.f32 %v1448_v0  ;;  %v736_v15 = vmul.f32 %v733_v62, %v1697_v18  ;;  %v28_v18 = vld [vmem:[%s1854_s0 + $0x28] sm:$0xff] }
 0x9d9   :  { %vm669_vm12 = vmor %vm667_vm11, %vm668_vm10  ;;  %1306 = vmatmul.msk.f32.gmra.mxu0 %vm32_vm2, %v28_v18 }
 0x9da   :  { %v664_v4 = vsub.f32 1.0, %v663_v2 }
 0x9dc   :  { %v665_v6 = vmul.f32 %v1448_v0, %v664_v4 }
 0x9de   :  { %v666_v7 = vadd.f32 %v1448_v0, %v665_v6 }
 0x9e0   :  { %v670_v10 = vsel %vm669_vm12, %v1448_v0, %v666_v7 }
 0x9e1   :  { %v675_v13 = vsel %vm672_vm13, %v674_v11, %v670_v10 }
 0x9e2   :  { %v678_v22 = vmul.f32 %v675_v13, %v1702_v26 }
 0xa16   :  { %v739_v61 = vpop.permute.xlu2 %738 }
 0xa17   :  { %v741_v63 = vmul.f32 %v739_v61, %v733_v62 }
 0xa19   :  { %743 = vrot.lane.b32.xlu1 %v741_v63, %s1513_s20 }
 0xa36   :  { %v681_v12 = vpop.permute.xlu1 %680 }
 0xa37   :  { %v683_v14 = vmul.f32 %v681_v12, %v675_v13 }
 0xa39   :  { %685 = vrot.lane.b32.xlu0 %v683_v14, %s1513_s20 }
 0xa56   :  { %v93_v28 = vpop.f32.mrf.mxu0 }
 0xa57   :  { %v94_v35 = vadd.f32 %v1561_v5, %v93_v28 }
 0xa8b   :  { %v744_v16 = vpop.permute.xlu1 %743 }
 0xa8c   :  { %v1731_v17 = vadd.f32 %v744_v16, %v736_v15 }
 0xa8e   :  { %1449 = vtanh.f32 %v1731_v17 }
 0xa94   :  { %v1450_v21 = vpop.eup %1449 }
 0xa95   :  { %749 = vrot.lane.b32.xlu0 %v1450_v21, %s1514_s21 }
 0xaab   :  { %v686_v23 = vpop.permute.xlu0 %685 }
 0xaac   :  { %v1736_v20 = vadd.f32 %v686_v23, %v678_v22 }
 0xaae   :  { %1451 = vtanh.f32 %v1736_v20 }
 0xab4   :  { %v1452_v27 = vpop.eup %1451 }
 0xab5   :  { %691 = vrot.lane.b32.xlu2 %v1452_v27, %s1514_s21  ;;  %v29_v27 = vld [vmem:[%s1854_s0 + $0x30] sm:$0xff] }
 0xab6   :  { %1307 = vmatmul.msk.f32.gmra.mxu0 %vm32_vm2, %v29_v27 }
 0xb07   :  { %v750_v25 = vpop.permute.xlu0 %749 }
 0xb08   :  { %v752_v29 = vmul.f32 %v750_v25, %v733_v62 }
 0xb0a   :  { %779 = vrot.lane.b32.xlu2 %v752_v29, %s1515_s4 }
 0xb0f   :  { %v692_v32 = vpop.permute.xlu2 %691 }
 0xb10   :  { %v694_v26 = vmul.f32 %v692_v32, %v675_v13 }
 0xb12   :  { %754 = vrot.lane.b32.xlu1 %v694_v26, %s1515_s4  ;;  %v1792_v26 = vld [vmem:[%s1853_s1 + $0x8] ss:$0 sm:$0xff] }
 0xb33   :  { %v96_v32 = vpop.f32.mrf.mxu0 }
 0xb64   :  { %v780_v19 = vpop.permute.xlu2 %779 }
 0xb65   :  { %1345 = vmatmul.msk.f32.vlgmr.msra.gmra.mxu3 %vm102_vm7, %v780_v19  ;;  %1348 = vmatmul.msk.f32.vlgmr.msrb.gmra.mxu1 %vm102_vm7, %v780_v19  ;;  %v97_v19 = vadd.f32 %v1792_v26, %v96_v32  ;;  %v1824_v32 = vld [vmem:[%s1853_s1 + $0x40] ss:$0 sm:$0xff] }
 0xb66   :  { %1360 = vmatpush.msk.msra.mxu3 %vm106_vm1, %v1578_v31  ;;  %1363 = vmatpush.msk.msrb.mxu1 %vm106_vm1, %v1538_v1 }
 0xb68   :  { %1090 = vmatpush.msra.mxu3 %v1595_v34  ;;  %1148 = vmatpush.msrb.mxu1 %v1548_v3 }
 0xb84   :  { %v755_v24 = vpop.permute.xlu1 %754 }
 0xb85   :  { %1343 = vmatmul.msk.f32.vlgmr.msra.gmra.mxu2 %vm102_vm7, %v755_v24 }
 0xb86   :  { %1358 = vmatpush.msk.msra.mxu2 %vm106_vm1, %v1573_v30 }
 0xb88   :  { %1065 = vmatpush.msra.mxu2 %v1590_v33 }
 0xbe2   :  { %v858_v36 = vpop.f32.mrf.mxu1 }
 0xbe3   :  { %v861_v37 = vadd.f32 %v858_v36, %v94_v35 }
 0xbe5   :  { %1453 = vtanh.f32 %v861_v37  ;;  %v1349_v43 = vmul.f32 -1.442695, %v861_v37 }
 0xbe8   :  { %v800_v1 = vpop.f32.mrf.mxu3 }
 0xbeb   :  { %v1454_v38 = vpop.eup %1453 }
 0xbec   :  { %884 = vrot.lane.b32.xlu1 %v1454_v38, %s1512_s19 }
 0xc08   :  { %v775_v40 = vpop.f32.mrf.mxu2 }
 0xc09   :  { %v801_v3 = vadd.f32 %v800_v1, %v775_v40 }
 0xc0b   :  { %v803_v41 = vadd.f32 %v1621_v39, %v801_v3 }
 0xc0d   :  { %1455 = vtanh.f32 %v803_v41  ;;  %v1346_v51 = vmul.f32 -1.442695, %v803_v41 }
 0xc0e   :  { %1457 = vpow2.f32 %v1349_v43 }
 0xc13   :  { %v1456_v42 = vpop.eup %1455 }
 0xc14   :  { %826 = vrot.lane.b32.xlu0 %v1456_v42, %s1512_s19  ;;  %v1458_v44 = vpop.eup %1457 }
 0xc15   :  { %v865_v45 = vadd.f32 1.0, %v1458_v44 }
 0xc17   :  { %1459 = vrcp.f32 %v865_v45  ;;  %v877_v50 = vand.u32 2147483648, %v865_v45  ;;  %vm871_vm15 = vweird.f32 %v865_v45  ;;  %v875_v52 = vand.u32 2147483647, %v865_v45 }
 0xc18   :  { %1461 = vpow2.f32 %v1346_v51 }
 0xc19   :  { %v878_v54 = vor.u32 1.1754944e-38, %v877_v50  ;;  %vm876_vm3 = vcmp.eq.f32.partialorder %v875_v52, 8.507059e+37 }
 0xc1d   :  { %v1460_v5 = vpop.eup %1459 }
 0xc1e   :  { %v867_v46 = vmul.f32 %v1460_v5, %v865_v45  ;;  %vm872_vm14 = vweird.f32 %v1460_v5  ;;  %v1462_v58 = vpop.eup %1461 }
 0xc1f   :  { %vm873_vm0 = vmor %vm871_vm15, %vm872_vm14  ;;  %v807_v59 = vadd.f32 1.0, %v1462_v58 }
 0xc20   :  { %v868_v47 = vsub.f32 1.0, %v867_v46 }
 0xc21   :  { %1463 = vrcp.f32 %v807_v59  ;;  %v819_v2 = vand.u32 2147483648, %v807_v59  ;;  %vm813_vm5 = vweird.f32 %v807_v59  ;;  %v817_v4 = vand.u32 2147483647, %v807_v59 }
 0xc22   :  { %v869_v48 = vmul.f32 %v1460_v5, %v868_v47 }
 0xc23   :  { %v820_v7 = vor.u32 1.1754944e-38, %v819_v2  ;;  %vm818_vm8 = vcmp.eq.f32.partialorder %v817_v4, 8.507059e+37 }
 0xc24   :  { %v870_v49 = vadd.f32 %v1460_v5, %v869_v48 }
 0xc26   :  { %v874_v53 = vsel %vm873_vm0, %v1460_v5, %v870_v49 }
 0xc27   :  { %v879_v56 = vsel %vm876_vm3, %v878_v54, %v874_v53  ;;  %v1464_v60 = vpop.eup %1463 }
 0xc28   :  { %v809_v61 = vmul.f32 %v1464_v60, %v807_v59  ;;  %vm814_vm4 = vweird.f32 %v1464_v60  ;;  %v882_v11 = vmul.f32 %v879_v56, %v1731_v17 }
 0xc29   :  { %vm815_vm6 = vmor %vm813_vm5, %vm814_vm4 }
 0xc2a   :  { %v810_v62 = vsub.f32 1.0, %v809_v61 }
 0xc2c   :  { %v811_v63 = vmul.f32 %v1464_v60, %v810_v62 }
 0xc2e   :  { %v812_v0 = vadd.f32 %v1464_v60, %v811_v63 }
 0xc30   :  { %v816_v6 = vsel %vm815_vm6, %v1464_v60, %v812_v0 }
 0xc31   :  { %v821_v9 = vsel %vm818_vm8, %v820_v7, %v816_v6 }
 0xc32   :  { %v824_v15 = vmul.f32 %v821_v9, %v1736_v20 }
 0xc5e   :  { %v885_v55 = vpop.permute.xlu1 %884 }
 0xc5f   :  { %v887_v57 = vmul.f32 %v885_v55, %v879_v56 }
 0xc61   :  { %889 = vrot.lane.b32.xlu0 %v887_v57, %s1513_s20 }
 0xc86   :  { %v827_v8 = vpop.permute.xlu0 %826 }
 0xc87   :  { %v829_v10 = vmul.f32 %v827_v8, %v821_v9 }
 0xc89   :  { %831 = vrot.lane.b32.xlu2 %v829_v10, %s1513_s20 }
 0xcd3   :  { %v890_v12 = vpop.permute.xlu0 %889 }
 0xcd4   :  { %v1765_v13 = vadd.f32 %v890_v12, %v882_v11 }
 0xcd6   :  { %1465 = vtanh.f32 %v1765_v13 }
 0xcdc   :  { %v1466_v14 = vpop.eup %1465 }
 0xcdd   :  { %895 = vrot.lane.b32.xlu2 %v1466_v14, %s1514_s21 }
 0xce3   :  { %v832_v16 = vpop.permute.xlu2 %831 }
 0xce4   :  { %v1770_v21 = vadd.f32 %v832_v16, %v824_v15 }
 0xce6   :  { %1467 = vtanh.f32 %v1770_v21 }
 0xcec   :  { %v1468_v22 = vpop.eup %1467 }
 0xced   :  { %837 = vrot.lane.b32.xlu1 %v1468_v22, %s1514_s21 }
 0xd37   :  { %v896_v23 = vpop.permute.xlu2 %895 }
 0xd38   :  { %v898_v17 = vmul.f32 %v896_v23, %v879_v56 }
 0xd3a   :  { %925 = vrot.lane.b32.xlu1 %v898_v17, %s1515_s4 }
 0xd5f   :  { %v838_v18 = vpop.permute.xlu1 %837 }
 0xd60   :  { %v840_v20 = vmul.f32 %v838_v18, %v821_v9 }
 0xd62   :  { %900 = vrot.lane.b32.xlu0 %v840_v20, %s1515_s4 }
 0xdac   :  { %v926_v25 = vpop.permute.xlu1 %925 }
 0xdad   :  { %1353 = vmatmul.msk.f32.vlgmr.msrb.gmra.mxu3 %vm102_vm7, %v926_v25  ;;  %1356 = vmatmul.msk.f32.vlgmr.msra.gmra.mxu1 %vm102_vm7, %v926_v25 }
 0xdae   :  { %1368 = vmatpush.msk.msrb.mxu3 %vm106_vm1, %v1578_v31 }
 0xdb0   :  { %1236 = vmatpush.msrb.mxu3 %v1595_v34 }
 0xdd4   :  { %v901_v29 = vpop.permute.xlu0 %900 }
 0xdd5   :  { %1351 = vmatmul.msk.f32.vlgmr.msrb.gmra.mxu2 %vm102_vm7, %v901_v29 }
 0xdd6   :  { %1366 = vmatpush.msk.msrb.mxu2 %vm106_vm1, %v1573_v30 }
 0xdd8   :  { %1211 = vmatpush.msrb.mxu2 %v1590_v33 }
 0xe2a   :  { %v1004_v24 = vpop.f32.mrf.mxu1 }
 0xe2b   :  { %v1007_v31 = vadd.f32 %v1004_v24, %v97_v19 }
 0xe2d   :  { %1469 = vtanh.f32 %v1007_v31  ;;  %v1357_v37 = vmul.f32 -1.442695, %v1007_v31 }
 0xe30   :  { %v946_v28 = vpop.f32.mrf.mxu3 }
 0xe33   :  { %v1470_v34 = vpop.eup %1469 }
 0xe34   :  { %1030 = vrot.lane.b32.xlu0 %v1470_v34, %s1512_s19 }
 0xe58   :  { %v921_v35 = vpop.f32.mrf.mxu2 }
 0xe59   :  { %v947_v36 = vadd.f32 %v946_v28, %v921_v35 }
 0xe5b   :  { %v949_v30 = vadd.f32 %v1621_v39, %v947_v36 }
 0xe5d   :  { %1471 = vtanh.f32 %v949_v30  ;;  %v1354_v3 = vmul.f32 -1.442695, %v949_v30 }
 0xe5e   :  { %1473 = vpow2.f32 %v1357_v37 }
 0xe63   :  { %v1472_v33 = vpop.eup %1471 }
 0xe64   :  { %972 = vrot.lane.b32.xlu2 %v1472_v33, %s1512_s19  ;;  %v1474_v38 = vpop.eup %1473 }
 0xe65   :  { %v1011_v1 = vadd.f32 1.0, %v1474_v38 }
 0xe67   :  { %1475 = vrcp.f32 %v1011_v1  ;;  %v1023_v39 = vand.u32 2147483648, %v1011_v1  ;;  %vm1017_vm9 = vweird.f32 %v1011_v1  ;;  %v1021_v46 = vand.u32 2147483647, %v1011_v1 }
 0xe68   :  { %1477 = vpow2.f32 %v1354_v3 }
 0xe69   :  { %v1024_v48 = vor.u32 1.1754944e-38, %v1023_v39  ;;  %vm1022_vm11 = vcmp.eq.f32.partialorder %v1021_v46, 8.507059e+37 }
 0xe6d   :  { %v1476_v40 = vpop.eup %1475 }
 0xe6e   :  { %v1013_v41 = vmul.f32 %v1476_v40, %v1011_v1  ;;  %v1478_v43 = vpop.eup %1477  ;;  %vm1018_vm1 = vweird.f32 %v1476_v40 }
 0xe6f   :  { %v953_v45 = vadd.f32 1.0, %v1478_v43  ;;  %vm1019_vm10 = vmor %vm1017_vm9, %vm1018_vm1 }
 0xe70   :  { %v1014_v42 = vsub.f32 1.0, %v1013_v41 }
 0xe71   :  { %1479 = vrcp.f32 %v953_v45  ;;  %v965_v57 = vand.u32 2147483648, %v953_v45  ;;  %vm959_vm13 = vweird.f32 %v953_v45  ;;  %v963_v58 = vand.u32 2147483647, %v953_v45 }
 0xe72   :  { %v1015_v44 = vmul.f32 %v1476_v40, %v1014_v42 }
 0xe73   :  { %v966_v60 = vor.u32 1.1754944e-38, %v965_v57  ;;  %vm964_vm15 = vcmp.eq.f32.partialorder %v963_v58, 8.507059e+37 }
 0xe74   :  { %v1016_v5 = vadd.f32 %v1476_v40, %v1015_v44 }
 0xe76   :  { %v1020_v47 = vsel %vm1019_vm10, %v1476_v40, %v1016_v5 }
 0xe77   :  { %v1025_v50 = vsel %vm1022_vm11, %v1024_v48, %v1020_v47  ;;  %v1480_v52 = vpop.eup %1479 }
 0xe78   :  { %v955_v53 = vmul.f32 %v1480_v52, %v953_v45  ;;  %vm960_vm12 = vweird.f32 %v1480_v52  ;;  %v1028_v0 = vmul.f32 %v1025_v50, %v1765_v13  ;;  %v30_v13 = vld [vmem:[%s1854_s0 + $0x38] sm:$0xff] }
 0xe79   :  { %vm961_vm14 = vmor %vm959_vm13, %vm960_vm12  ;;  %1308 = vmatmul.msk.f32.gmra.mxu0 %vm32_vm2, %v30_v13  ;;  %vm1294_vm13 = vcmask 7168  }
 0xe7a   :  { %v956_v54 = vsub.f32 1.0, %v955_v53 }
 0xe7c   :  { %v957_v55 = vmul.f32 %v1480_v52, %v956_v54 }
 0xe7e   :  { %v958_v56 = vadd.f32 %v1480_v52, %v957_v55 }
 0xe80   :  { %v962_v59 = vsel %vm961_vm14, %v1480_v52, %v958_v56 }
 0xe81   :  { %v967_v62 = vsel %vm964_vm15, %v966_v60, %v962_v59 }
 0xe82   :  { %v970_v7 = vmul.f32 %v967_v62, %v1770_v21 }
 0xea6   :  { %v1031_v49 = vpop.permute.xlu0 %1030 }
 0xea7   :  { %v1033_v51 = vmul.f32 %v1031_v49, %v1025_v50 }
 0xea9   :  { %1035 = vrot.lane.b32.xlu2 %v1033_v51, %s1513_s20 }
 0xebe   :  { %v973_v61 = vpop.permute.xlu2 %972 }
 0xebf   :  { %v975_v63 = vmul.f32 %v973_v61, %v967_v62 }
 0xec1   :  { %977 = vrot.lane.b32.xlu1 %v975_v63, %s1513_s20 }
 0xef6   :  { %v99_v22 = vpop.f32.mrf.mxu0 }
 0xef7   :  { %v100_v23 = vadd.f32 %v1792_v26, %v99_v22 }
 0xf03   :  { %v1036_v2 = vpop.permute.xlu2 %1035 }
 0xf04   :  { %v1801_v4 = vadd.f32 %v1036_v2, %v1028_v0 }
 0xf06   :  { %1481 = vtanh.f32 %v1801_v4 }
 0xf0c   :  { %v1482_v6 = vpop.eup %1481 }
 0xf0d   :  { %1041 = vrot.lane.b32.xlu1 %v1482_v6, %s1514_s21 }
 0xf33   :  { %v978_v8 = vpop.permute.xlu1 %977 }
 0xf34   :  { %v1806_v9 = vadd.f32 %v978_v8, %v970_v7 }
 0xf36   :  { %1483 = vtanh.f32 %v1806_v9 }
 0xf3c   :  { %v1484_v10 = vpop.eup %1483 }
 0xf3d   :  { %983 = vrot.lane.b32.xlu0 %v1484_v10, %s1514_s21 }
 0xf7f   :  { %v1042_v11 = vpop.permute.xlu1 %1041 }
 0xf80   :  { %v1044_v12 = vmul.f32 %v1042_v11, %v1025_v50 }
 0xf82   :  { %1071 = vrot.lane.b32.xlu0 %v1044_v12, %s1515_s4 }
 0xfaf   :  { %v984_v14 = vpop.permute.xlu0 %983 }
 0xfb0   :  { %v986_v15 = vmul.f32 %v984_v14, %v967_v62 }
 0xfb2   :  { %1046 = vrot.lane.b32.xlu2 %v986_v15, %s1515_s4 }
 0xff4   :  { %v1072_v16 = vpop.permute.xlu0 %1071 }
 0xff5   :  { %1361 = vmatmul.msk.f32.vlgmr.msra.gmra.mxu3 %vm102_vm7, %v1072_v16  ;;  %1364 = vmatmul.msk.f32.vlgmr.msrb.gmra.mxu1 %vm102_vm7, %v1072_v16 }
0x100c   :  { %v1047_v21 = vpop.permute.xlu2 %1046 }
0x100d   :  { %1359 = vmatmul.msk.f32.vlgmr.msra.gmra.mxu2 %vm102_vm7, %v1047_v21  ;;  %v1379_v21 = vld [vmem:[%s1853_s1 + $0x48] ss:$0 sm:$0xff] }
0x1072   :  { %v1150_v17 = vpop.f32.mrf.mxu1 }
0x1073   :  { %v1153_v27 = vadd.f32 %v1150_v17, %v100_v23 }
0x1075   :  { %1485 = vtanh.f32 %v1153_v27  ;;  %v1365_v26 = vmul.f32 -1.442695, %v1153_v27 }
0x1078   :  { %v1092_v20 = vpop.f32.mrf.mxu3 }
0x107b   :  { %v1486_v18 = vpop.eup %1485 }
0x107c   :  { %1176 = vrot.lane.b32.xlu2 %v1486_v18, %s1512_s19 }
0x1090   :  { %v1067_v25 = vpop.f32.mrf.mxu2 }
0x1091   :  { %v1093_v29 = vadd.f32 %v1092_v20, %v1067_v25 }
0x1093   :  { %v1095_v19 = vadd.f32 %v1824_v32, %v1093_v29 }
0x1095   :  { %1487 = vtanh.f32 %v1095_v19  ;;  %v1362_v43 = vmul.f32 -1.442695, %v1095_v19 }
0x1096   :  { %1489 = vpow2.f32 %v1365_v26 }
0x109b   :  { %v1488_v24 = vpop.eup %1487 }
0x109c   :  { %1118 = vrot.lane.b32.xlu1 %v1488_v24, %s1512_s19  ;;  %v1490_v31 = vpop.eup %1489 }
0x109d   :  { %v1157_v34 = vadd.f32 1.0, %v1490_v31 }
0x109f   :  { %1491 = vrcp.f32 %v1157_v34  ;;  %v1169_v37 = vand.u32 2147483648, %v1157_v34  ;;  %vm1163_vm0 = vweird.f32 %v1157_v34  ;;  %v1167_v38 = vand.u32 2147483647, %v1157_v34 }
0x10a0   :  { %1493 = vpow2.f32 %v1362_v43 }
0x10a1   :  { %v1170_v40 = vor.u32 1.1754944e-38, %v1169_v37  ;;  %vm1168_vm4 = vcmp.eq.f32.partialorder %v1167_v38, 8.507059e+37 }
0x10a5   :  { %v1492_v28 = vpop.eup %1491 }
0x10a6   :  { %v1159_v35 = vmul.f32 %v1492_v28, %v1157_v34  ;;  %vm1164_vm2 = vweird.f32 %v1492_v28  ;;  %v1494_v44 = vpop.eup %1493 }
0x10a7   :  { %vm1165_vm3 = vmor %vm1163_vm0, %vm1164_vm2  ;;  %v1099_v45 = vadd.f32 1.0, %v1494_v44 }
0x10a8   :  { %v1160_v36 = vsub.f32 1.0, %v1159_v35 }
0x10a9   :  { %1495 = vrcp.f32 %v1099_v45  ;;  %v1111_v49 = vand.u32 2147483648, %v1099_v45  ;;  %vm1105_vm6 = vweird.f32 %v1099_v45  ;;  %v1109_v50 = vand.u32 2147483647, %v1099_v45 }
0x10aa   :  { %v1161_v30 = vmul.f32 %v1492_v28, %v1160_v36 }
0x10ab   :  { %v1112_v52 = vor.u32 1.1754944e-38, %v1111_v49  ;;  %vm1110_vm1 = vcmp.eq.f32.partialorder %v1109_v50, 8.507059e+37 }
0x10ac   :  { %v1162_v33 = vadd.f32 %v1492_v28, %v1161_v30 }
0x10ae   :  { %v1166_v1 = vsel %vm1165_vm3, %v1492_v28, %v1162_v33 }
0x10af   :  { %v1171_v41 = vsel %vm1168_vm4, %v1170_v40, %v1166_v1  ;;  %v1496_v5 = vpop.eup %1495  ;;  %v1380_v40 = vld [vmem:[%s1853_s1 + $0x50] ss:$0 sm:$0xff] }
0x10b0   :  { %v1101_v39 = vmul.f32 %v1496_v5, %v1099_v45  ;;  %vm1106_vm5 = vweird.f32 %v1496_v5  ;;  %v1174_v56 = vmul.f32 %v1171_v41, %v1801_v4 }
0x10b1   :  { %vm1107_vm8 = vmor %vm1105_vm6, %vm1106_vm5 }
0x10b2   :  { %v1102_v46 = vsub.f32 1.0, %v1101_v39 }
0x10b4   :  { %v1103_v47 = vmul.f32 %v1496_v5, %v1102_v46 }
0x10b6   :  { %v1104_v48 = vadd.f32 %v1496_v5, %v1103_v47 }
0x10b8   :  { %v1108_v51 = vsel %vm1107_vm8, %v1496_v5, %v1104_v48 }
0x10b9   :  { %v1113_v54 = vsel %vm1110_vm1, %v1112_v52, %v1108_v51 }
0x10ba   :  { %v1116_v60 = vmul.f32 %v1113_v54, %v1806_v9 }
0x10d6   :  { %v1177_v3 = vpop.permute.xlu2 %1176 }
0x10d7   :  { %v1179_v42 = vmul.f32 %v1177_v3, %v1171_v41 }
0x10d9   :  { %1181 = vrot.lane.b32.xlu1 %v1179_v42, %s1513_s20 }
0x110e   :  { %v1119_v53 = vpop.permute.xlu1 %1118 }
0x110f   :  { %v1121_v55 = vmul.f32 %v1119_v53, %v1113_v54 }
0x1111   :  { %1123 = vrot.lane.b32.xlu0 %v1121_v55, %s1513_s20 }
0x114b   :  { %v1182_v57 = vpop.permute.xlu1 %1181 }
0x114c   :  { %v1184_v58 = vadd.f32 %v1182_v57, %v1174_v56 }
0x114e   :  { %1497 = vtanh.f32 %v1184_v58 }
0x1154   :  { %v1498_v59 = vpop.eup %1497 }
0x1155   :  { %1187 = vrot.lane.b32.xlu0 %v1498_v59, %s1514_s21 }
0x1183   :  { %v1124_v61 = vpop.permute.xlu0 %1123 }
0x1184   :  { %v1126_v62 = vadd.f32 %v1124_v61, %v1116_v60 }
0x1186   :  { %1499 = vtanh.f32 %v1126_v62 }
0x118c   :  { %v1500_v63 = vpop.eup %1499 }
0x118d   :  { %1129 = vrot.lane.b32.xlu2 %v1500_v63, %s1514_s21 }
0x11c7   :  { %v1188_v0 = vpop.permute.xlu0 %1187 }
0x11c8   :  { %v1190_v2 = vmul.f32 %v1188_v0, %v1171_v41 }
0x11ca   :  { %1217 = vrot.lane.b32.xlu2 %v1190_v2, %s1515_s4 }
0x11e7   :  { %v1130_v6 = vpop.permute.xlu2 %1129 }
0x11e8   :  { %v1132_v4 = vmul.f32 %v1130_v6, %v1113_v54 }
0x11ea   :  { %1192 = vrot.lane.b32.xlu1 %v1132_v4, %s1515_s4 }
0x1224   :  { %v1218_v7 = vpop.permute.xlu2 %1217 }
0x1225   :  { %1369 = vmatmul.msk.f32.vlgmr.msrb.gmra.mxu3 %vm102_vm7, %v1218_v7 }
0x125c   :  { %v1193_v8 = vpop.permute.xlu1 %1192 }
0x125d   :  { %1367 = vmatmul.msk.f32.vlgmr.msrb.gmra.mxu2 %vm102_vm7, %v1193_v8 }
0x12a8   :  { %v1238_v9 = vpop.f32.mrf.mxu3 }
0x12e0   :  { %v1213_v10 = vpop.f32.mrf.mxu2 }
0x12e1   :  { %v1239_v11 = vadd.f32 %v1238_v9, %v1213_v10 }
0x12e3   :  { %v1241_v12 = vadd.f32 %v1824_v32, %v1239_v11 }
0x12e5   :  { %1501 = vtanh.f32 %v1241_v12  ;;  %v1370_v14 = vmul.f32 -1.442695, %v1241_v12 }
0x12e7   :  { %1503 = vpow2.f32 %v1370_v14 }
0x12eb   :  { %v1502_v13 = vpop.eup %1501 }
0x12ec   :  { %1264 = vrot.lane.b32.xlu0 %v1502_v13, %s1512_s19 }
0x12ed   :  { %v1504_v15 = vpop.eup %1503 }
0x12ee   :  { %v1245_v16 = vadd.f32 1.0, %v1504_v15 }
0x12f0   :  { %1505 = vrcp.f32 %v1245_v16  ;;  %v1257_v20 = vand.u32 2147483648, %v1245_v16  ;;  %vm1251_vm10 = vweird.f32 %v1245_v16  ;;  %v1255_v25 = vand.u32 2147483647, %v1245_v16 }
0x12f2   :  { %v1258_v32 = vor.u32 1.1754944e-38, %v1257_v20  ;;  %vm1256_vm12 = vcmp.eq.f32.partialorder %v1255_v25, 8.507059e+37 }
0x12f4   :  { %1281 = vrot.lane.b32.xlu0 %v1379_v21, %s1516_s27 }
0x12f6   :  { %v1506_v22 = vpop.eup %1505 }
0x12f7   :  { %v1247_v23 = vmul.f32 %v1506_v22, %v1245_v16  ;;  %vm1252_vm9 = vweird.f32 %v1506_v22 }
0x12f8   :  { %vm1253_vm11 = vmor %vm1251_vm10, %vm1252_vm9 }
0x12f9   :  { %v1248_v17 = vsub.f32 1.0, %v1247_v23 }
0x12fb   :  { %v1249_v27 = vmul.f32 %v1506_v22, %v1248_v17 }
0x12fd   :  { %v1250_v18 = vadd.f32 %v1506_v22, %v1249_v27 }
0x12ff   :  { %v1254_v29 = vsel %vm1253_vm11, %v1506_v22, %v1250_v18 }
0x1300   :  { %v1259_v24 = vsel %vm1256_vm12, %v1258_v32, %v1254_v29 }
0x1301   :  { %v1262_v31 = vmul.f32 %v1259_v24, %v1126_v62 }
0x135e   :  { %v1265_v19 = vpop.permute.xlu0 %1264 }
0x135f   :  { %v1267_v26 = vmul.f32 %v1265_v19, %v1259_v24 }
0x1361   :  { %1269 = vrot.lane.b32.xlu1 %v1267_v26, %s1513_s20 }
0x1366   :  { %v1282_v30 = vpop.permute.xlu0 %1281 }
0x13d3   :  { %v1270_v34 = vpop.permute.xlu1 %1269 }
0x13d4   :  { %v1272_v28 = vadd.f32 %v1270_v34, %v1262_v31 }
0x13d6   :  { %1507 = vtanh.f32 %v1272_v28 }
0x13dc   :  { %v1508_v35 = vpop.eup %1507 }
0x13dd   :  { %1275 = vrot.lane.b32.xlu2 %v1508_v35, %s1514_s21 }
0x1437   :  { %v1276_v36 = vpop.permute.xlu2 %1275 }
0x1438   :  { %v1278_v33 = vmul.f32 %v1276_v36, %v1259_v24 }
0x143a   :  { %v1284_v37 = vmul.f32 %v1282_v30, %v1278_v33 }
0x143c   :  { %1286 = vrot.lane.b32.xlu1 %v1284_v37, %s1515_s4 }
0x14ae   :  { %v1287_v38 = vpop.permute.xlu1 %1286 }
0x14af   :  { %v1289_v1 = vsel %vm102_vm7, %v1287_v38, 0.0 }
0x14b0   :  { %1290 = vadd.xlane.f32.xlu2 %v1289_v1 }
0x1523   :  { %v1291_v3 = vpop.xlane.xlu2 %1290 }
0x1524   :  { %v1293_v41 = vadd.f32 %v1380_v40, %v1291_v3 }
0x1526   :  { %1295 = vst.msk [vmem:[%s1855_s2] sm:$0xff] %vm1294_vm13, %v1293_v41 }

</bundles_post_ra>
